<compile_context>
chip_gen: v7x
topology: tpu7x:2x2x1
jax: 0.10.0
libtpu: 0.0.40
codegen_flags: <defaults>
</compile_context>

<pallas_src>
import functools

import jax
import jax.numpy as jnp
from jax import lax
from jax.experimental import pallas as pl
from jax.experimental.pallas import tpu as pltpu


def _round_up(x, m):
    return ((x + m - 1) // m) * m


# ----------------------------------------------------------------------------
# Fused forward kernel factory (n_layers, T, dims are static)
# ----------------------------------------------------------------------------
def _make_fused_kernel(n_layers, seq_len, embed_dim, hidden_dim):
    L, T, E, H = n_layers, seq_len, embed_dim, hidden_dim

    def kernel(*refs):
        # ---- parse refs: inputs, outputs, scratch ------------------------------
        x_ref, h0_ref, c0_ref = refs[0], refs[1], refs[2]      # (T*Bp,E), (L,Bp,H) x2
        w_refs = refs[3:3 + 3 * L]                             # per layer: wih_t, whh_t, bias
        fc_w_ref, fc_b_ref = refs[3 + 3 * L], refs[4 + 3 * L]  # (1,H), (1,1)
        hN_ref, cN_ref = refs[5 + 3 * L], refs[6 + 3 * L]      # (L,Bp,H) each
        probs_ref = refs[7 + 3 * L]                            # (Bp,1)
        seq_sc = refs[8 + 3 * L]                               # (T*Bp, H)  VMEM
        gx_sc = refs[9 + 3 * L]                                # (T*Bp, 4H) VMEM

        Bp = h0_ref.shape[1]        # padded batch, multiple of 8

        h = None
        for l in range(L):
            wih = w_refs[3 * l][...]        # (D_in, 4H)   (g-columns pre-scaled x2)
            whh = w_refs[3 * l + 1][...]    # (H, 4H)      (g-columns pre-scaled x2)
            b = w_refs[3 * l + 2][...]      # (1, 4H)      (g-columns pre-scaled x2)

            # Layer input, time-major flattened: row t*Bp + b (Bp % 8 == 0).
            x2d = x_ref[...] if l == 0 else seq_sc[...]        # (T*Bp, D_in)

            # Hoisted input projection for ALL timesteps (off the serial path):
            # one (T*Bp, D_in) @ (D_in, 4H) MXU matmul + bias.
            gx_sc[...] = jnp.dot(x2d, wih,
                                 preferred_element_type=jnp.float32) + b

            write_seq = (l < L - 1)   # last layer's sequence is never read

            def step(t, carry, whh=whh, write_seq=write_seq):
                h, c = carry
                row = pl.multiple_of(t * Bp, 8)      # sublane-aligned start
                # Only the recurrent matmul remains on the serial path.
                gates = gx_sc[pl.ds(row, Bp), :] + jnp.dot(
                    h, whh, preferred_element_type=jnp.float32)   # (Bp, 4H)
                # One full-width sigmoid; g-gate columns were pre-scaled by 2,
                # so tanh(z) = 2*sigmoid(2z) - 1 is a cheap VPU fixup.
                s = jax.nn.sigmoid(gates)
                i_g = s[:, 0 * H:1 * H]
                f_g = s[:, 1 * H:2 * H]
                g_g = 2.0 * s[:, 2 * H:3 * H] - 1.0
                o_g = s[:, 3 * H:4 * H]
                c_new = f_g * c + i_g * g_g
                h_new = o_g * jnp.tanh(c_new)
                if write_seq:
                    seq_sc[pl.ds(row, Bp), :] = h_new   # feeds next layer (VMEM only)
                return (h_new, c_new)

            h, c = lax.fori_loop(0, T, step, (h0_ref[l], c0_ref[l]),
                                 unroll=min(T, 8))
            hN_ref[l] = h
            cN_ref[l] = c

        # Fused FC head on the last timestep of the last layer, restricted to the
        # single column consumed downstream.  torch.exp(F.logsigmoid(x)) == sigmoid(x).
        logits = jnp.sum(h * fc_w_ref[...], axis=1, keepdims=True) + fc_b_ref[...]
        probs_ref[...] = jax.nn.sigmoid(logits)

    return kernel


# ----------------------------------------------------------------------------
# Full forward pass (mirrors Sentimental_Analysis.forward)
# ----------------------------------------------------------------------------
def sentimental_analysis_forward(params, x_ids, hidden):
    """
    x_ids : (B, T) int32 token ids
    hidden: (h0, c0) each (n_layers, B, H) float32
    returns (probs_last (B,), (h_n, c_n))
    """
    h0_all, c0_all = hidden
    n_layers, B, H = h0_all.shape
    T = x_ids.shape[1]
    E = params["embedding"].shape[1]

    # Pad batch to the f32 sublane tile (8) so all per-timestep scratch slices
    # inside the kernel are tile-aligned.
    Bp = max(8, _round_up(B, 8))
    pad_b = Bp - B

    # Embedding lookup (gather stays in XLA) directly into the time-major
    # flattened layout (T*Bp, E) used inside the kernel.
    ids_tm = jnp.transpose(x_ids, (1, 0))                                  # (T, B)
    if pad_b:
        ids_tm = jnp.pad(ids_tm, ((0, 0), (0, pad_b)))                     # (T, Bp)
    flat_ids = ids_tm.reshape(-1)                                          # (T*Bp,)
    x2d = jnp.take(params["embedding"], flat_ids, axis=0).astype(jnp.float32)

    h0_p = jnp.pad(h0_all, ((0, 0), (0, pad_b), (0, 0))) if pad_b else h0_all
    c0_p = jnp.pad(c0_all, ((0, 0), (0, pad_b), (0, 0))) if pad_b else c0_all

    # Pre-scale the g-gate columns by 2 so a single sigmoid covers all 4 gates
    # (tanh(z) = 2*sigmoid(2z) - 1 is applied inside the kernel).
    def scale_g(w):
        return w.at[..., 2 * H:3 * H].multiply(2.0)

    flat_w = []
    for lp in params["lstm"]:
        flat_w += [scale_g(lp["w_ih_t"]), scale_g(lp["w_hh_t"]), scale_g(lp["bias"])]

    # FC head: only x.view(B,-1)[:, -1] is consumed -> only the last output column.
    fc_w_last = params["fc_w_t"][:, -1].reshape(1, H)
    fc_b_last = params["fc_b"][:, -1].reshape(1, 1)

    kernel = _make_fused_kernel(n_layers, T, E, H)

    vmem_spec = pl.BlockSpec(memory_space=pltpu.MemorySpace.VMEM)
    n_inputs = 3 + 3 * n_layers + 2

    # TODO(synk): nn.Dropout treated as identity (inference; p-scaling omitted).
    h_n, c_n, probs = pl.pallas_call(
        kernel,
        out_shape=(
            jax.ShapeDtypeStruct((n_layers, Bp, H), jnp.float32),
            jax.ShapeDtypeStruct((n_layers, Bp, H), jnp.float32),
            jax.ShapeDtypeStruct((Bp, 1), jnp.float32),
        ),
        in_specs=[vmem_spec] * n_inputs,
        out_specs=(vmem_spec, vmem_spec, vmem_spec),
        scratch_shapes=[
            pltpu.VMEM((T * Bp, H), jnp.float32),        # inter-layer sequence
            pltpu.VMEM((T * Bp, 4 * H), jnp.float32),    # hoisted gate pre-activations
        ],
        compiler_params=pltpu.CompilerParams(
            vmem_limit_bytes=64 * 1024 * 1024),
    )(x2d, h0_p, c0_p, *flat_w, fc_w_last, fc_b_last)

    out = probs[:B, 0]                       # == sigmoid(fc(h_T))[:, -1]
    return out, (h_n[:, :B], c_n[:, :B])


# ----------------------------------------------------------------------------
# Pure-JAX reference (same params / same f32 math) for correctness checking
# ----------------------------------------------------------------------------
def _reference_forward(params, x_ids, hidden):
    h0_all, c0_all = hidden
    _, _, H = h0_all.shape
    emb = jnp.take(params["embedding"], x_ids, axis=0).astype(jnp.float32)  # (B,T,E)
    x = jnp.transpose(emb, (1, 0, 2))                                       # (T,B,E)
    h_fin, c_fin = [], []
    for l, lp in enumerate(params["lstm"]):
        def step(carry, x_t, lp=lp):
            h, c = carry
            gates = x_t @ lp["w_ih_t"] + h @ lp["w_hh_t"] + lp["bias"]
            i = jax.nn.sigmoid(gates[:, 0 * H:1 * H])
            f = jax.nn.sigmoid(gates[:, 1 * H:2 * H])
            g = jnp.tanh(gates[:, 2 * H:3 * H])
            o = jax.nn.sigmoid(gates[:, 3 * H:4 * H])
            c = f * c + i * g
            h = o * jnp.tanh(c)
            return (h, c), h
        (h, c), seq = lax.scan(step, (h0_all[l], c0_all[l]), x)
        x = seq
        h_fin.append(h)
        c_fin.append(c)
    probs = jax.nn.sigmoid(x[-1] @ params["fc_w_t"] + params["fc_b"])
    return probs[:, -1], (jnp.stack(h_fin), jnp.stack(c_fin))


# ----------------------------------------------------------------------------
# Deterministic parameter construction (PyTorch-style uniform init)
# ----------------------------------------------------------------------------
def init_params(key, vocab, embed_dim, hidden_dim, output_size, n_layers):
    keys = jax.random.split(key, 3 + 3 * n_layers)
    k = 1.0 / jnp.sqrt(hidden_dim)

    params = {
        "embedding": jax.random.normal(keys[0], (vocab, embed_dim), jnp.float32),
        "fc_w_t": jax.random.uniform(keys[1], (hidden_dim, output_size),
                                     jnp.float32, -k, k),
        "fc_b": jax.random.uniform(keys[2], (1, output_size),
                                   jnp.float32, -k, k),
        "lstm": [],
    }
    for l in range(n_layers):
        d_in = embed_dim if l == 0 else hidden_dim
        kw = keys[3 + 3 * l:3 + 3 * (l + 1)]
        w_ih_t = jax.random.uniform(kw[0], (d_in, 4 * hidden_dim),
                                    jnp.float32, -k, k)
        w_hh_t = jax.random.uniform(kw[1], (hidden_dim, 4 * hidden_dim),
                                    jnp.float32, -k, k)
        bias = jax.random.uniform(kw[2], (1, 4 * hidden_dim),
                                  jnp.float32, -k, k)   # b_ih + b_hh combined
        params["lstm"].append({"w_ih_t": w_ih_t, "w_hh_t": w_hh_t, "bias": bias})
    return params


if __name__ == "__main__":
    # Small shapes consistent with the module
    B, T = 2, 8
    VOCAB, EMBED, HIDDEN, OUT, N_LAYERS = 50, 16, 32, 1, 2

    root = jax.random.PRNGKey(0)
    k_param, k_ids = jax.random.split(root)

    params = init_params(k_param, VOCAB, EMBED, HIDDEN, OUT, N_LAYERS)

    x_ids = jax.random.randint(k_ids, (B, T), 0, VOCAB, dtype=jnp.int32)
    h0 = jnp.zeros((N_LAYERS, B, HIDDEN), jnp.float32)
    c0 = jnp.zeros((N_LAYERS, B, HIDDEN), jnp.float32)

    fwd = jax.jit(functools.partial(sentimental_analysis_forward, params))
    out, (h_n, c_n) = fwd(x_ids, (h0, c0))
    jax.block_until_ready((out, h_n, c_n))

    # Correctness vs pure-JAX reference (same params, same f32 math).
    ref_out, (ref_h, ref_c) = _reference_forward(params, x_ids, (h0, c0))

    assert out.shape == (B,)
    assert h_n.shape == (N_LAYERS, B, HIDDEN)
    assert c_n.shape == (N_LAYERS, B, HIDDEN)
    assert bool(jnp.all(jnp.isfinite(out)))
    assert bool(jnp.allclose(out, ref_out, rtol=1e-3, atol=1e-3))
    assert bool(jnp.allclose(h_n, ref_h, rtol=1e-3, atol=1e-3))
    assert bool(jnp.allclose(c_n, ref_c, rtol=1e-3, atol=1e-3))
    print("KERNEL_OK")
</pallas_src>

<mosaic_0001>
module attributes {stable_mosaic.version = 11 : i64} {
  func.func @kernel(%arg0: memref<64x16xf32, #tpu.memory_space<vmem>>, %arg1: memref<2x8x32xf32, #tpu.memory_space<vmem>>, %arg2: memref<2x8x32xf32, #tpu.memory_space<vmem>>, %arg3: memref<16x128xf32, #tpu.memory_space<vmem>>, %arg4: memref<32x128xf32, #tpu.memory_space<vmem>>, %arg5: memref<1x128xf32, #tpu.memory_space<vmem>>, %arg6: memref<32x128xf32, #tpu.memory_space<vmem>>, %arg7: memref<32x128xf32, #tpu.memory_space<vmem>>, %arg8: memref<1x128xf32, #tpu.memory_space<vmem>>, %arg9: memref<1x32xf32, #tpu.memory_space<vmem>>, %arg10: memref<1x1xf32, #tpu.memory_space<vmem>>, %arg11: memref<2x8x32xf32, #tpu.memory_space<vmem>>, %arg12: memref<2x8x32xf32, #tpu.memory_space<vmem>>, %arg13: memref<8x1xf32, #tpu.memory_space<vmem>>, %arg14: memref<64x32xf32, #tpu.memory_space<vmem>>, %arg15: memref<64x128xf32, #tpu.memory_space<vmem>>) attributes {dimension_semantics = [], scalar_prefetch = 0 : i64, scratch_operands = 2 : i64, tpu.core_type = #tpu.core_type<tc>} {
    %c0 = arith.constant 0 : index
    %c0_0 = arith.constant 0 : index
    %0 = vector.load %arg3[%c0, %c0_0] : memref<16x128xf32, #tpu.memory_space<vmem>>, vector<16x128xf32>
    %c0_1 = arith.constant 0 : index
    %c0_2 = arith.constant 0 : index
    %1 = vector.load %arg4[%c0_1, %c0_2] : memref<32x128xf32, #tpu.memory_space<vmem>>, vector<32x128xf32>
    %c0_3 = arith.constant 0 : index
    %c0_4 = arith.constant 0 : index
    %2 = vector.load %arg5[%c0_3, %c0_4] : memref<1x128xf32, #tpu.memory_space<vmem>>, vector<1x128xf32>
    %c0_5 = arith.constant 0 : index
    %c0_6 = arith.constant 0 : index
    %3 = vector.load %arg0[%c0_5, %c0_6] : memref<64x16xf32, #tpu.memory_space<vmem>>, vector<64x16xf32>
    %cst = arith.constant dense<0.000000e+00> : vector<64x128xf32>
    %4 = tpu.matmul %3, %0, %cst {dimension_numbers = #tpu.dot_dimension_numbers<[1], [0], [0], [1], [0, 0, 1, 1], [], []>} : vector<64x16xf32>, vector<16x128xf32>, vector<64x128xf32> -> vector<64x128xf32>
    %5 = vector.broadcast %2 : vector<1x128xf32> to vector<64x128xf32>
    %6 = arith.addf %4, %5 : vector<64x128xf32>
    %c0_7 = arith.constant 0 : index
    %c0_8 = arith.constant 0 : index
    %7 = vector.load %arg15[%c0_7, %c0_8] : memref<64x128xf32, #tpu.memory_space<vmem>>, vector<64x128xf32>
    tpu.vector_store %arg15[%c0_7, %c0_8], %6 {strides = array<i32>} : memref<64x128xf32, #tpu.memory_space<vmem>>, vector<64x128xf32>,
    %c0_9 = arith.constant 0 : index
    %c0_10 = arith.constant 0 : index
    %c0_11 = arith.constant 0 : index
    %8 = vector.load %arg1[%c0_9, %c0_10, %c0_11] : memref<2x8x32xf32, #tpu.memory_space<vmem>>, vector<1x8x32xf32>
    %9 = vector.shape_cast %8 : vector<1x8x32xf32> to vector<8x32xf32>
    %c0_12 = arith.constant 0 : index
    %c0_13 = arith.constant 0 : index
    %c0_14 = arith.constant 0 : index
    %10 = vector.load %arg2[%c0_12, %c0_13, %c0_14] : memref<2x8x32xf32, #tpu.memory_space<vmem>>, vector<1x8x32xf32>
    %11 = vector.shape_cast %10 : vector<1x8x32xf32> to vector<8x32xf32>
    %c0_i32 = arith.constant 0 : i32
    %c8_i32 = arith.constant 8 : i32
    %12 = arith.muli %c0_i32, %c8_i32 : i32
    %13 = tpu.assume_multiple %12, 8 : i32
    %14 = arith.index_cast %13 : i32 to index
    %c0_15 = arith.constant 0 : index
    %15 = vector.load %arg15[%14, %c0_15] : memref<64x128xf32, #tpu.memory_space<vmem>>, vector<8x128xf32>
    %cst_16 = arith.constant dense<0.000000e+00> : vector<8x128xf32>
    %16 = tpu.matmul %9, %1, %cst_16 {dimension_numbers = #tpu.dot_dimension_numbers<[1], [0], [0], [1], [0, 0, 1, 1], [], []>} : vector<8x32xf32>, vector<32x128xf32>, vector<8x128xf32> -> vector<8x128xf32>
    %17 = arith.addf %15, %16 : vector<8x128xf32>
    %18 = arith.negf %17 : vector<8x128xf32>
    %19 = math.exp %18 : vector<8x128xf32>
    %cst_17 = arith.constant 1.000000e+00 : f32
    %20 = vector.broadcast %cst_17 : f32 to vector<8x128xf32>
    %21 = arith.addf %20, %19 : vector<8x128xf32>
    %22 = arith.divf %20, %21 : vector<8x128xf32>
    %23 = vector.extract_strided_slice %22 {offsets = [0, 0], sizes = [8, 32], strides = [1, 1]} : vector<8x128xf32> to vector<8x32xf32>
    %24 = vector.extract_strided_slice %22 {offsets = [0, 32], sizes = [8, 32], strides = [1, 1]} : vector<8x128xf32> to vector<8x32xf32>
    %25 = vector.extract_strided_slice %22 {offsets = [0, 64], sizes = [8, 32], strides = [1, 1]} : vector<8x128xf32> to vector<8x32xf32>
    %cst_18 = arith.constant 2.000000e+00 : f32
    %26 = vector.broadcast %cst_18 : f32 to vector<8x32xf32>
    %27 = arith.mulf %26, %25 : vector<8x32xf32>
    %cst_19 = arith.constant 1.000000e+00 : f32
    %28 = vector.broadcast %cst_19 : f32 to vector<8x32xf32>
    %29 = arith.subf %27, %28 : vector<8x32xf32>
    %30 = vector.extract_strided_slice %22 {offsets = [0, 96], sizes = [8, 32], strides = [1, 1]} : vector<8x128xf32> to vector<8x32xf32>
    %31 = arith.mulf %24, %11 : vector<8x32xf32>
    %32 = arith.mulf %23, %29 : vector<8x32xf32>
    %33 = arith.addf %31, %32 : vector<8x32xf32>
    %34 = math.tanh %33 : vector<8x32xf32>
    %35 = arith.mulf %30, %34 : vector<8x32xf32>
    %36 = arith.index_cast %13 : i32 to index
    %c0_20 = arith.constant 0 : index
    %37 = vector.load %arg14[%36, %c0_20] : memref<64x32xf32, #tpu.memory_space<vmem>>, vector<8x32xf32>
    tpu.vector_store %arg14[%36, %c0_20], %35 {strides = array<i32>} : memref<64x32xf32, #tpu.memory_space<vmem>>, vector<8x32xf32>,
    %c1_i32 = arith.constant 1 : i32
    %c8_i32_21 = arith.constant 8 : i32
    %38 = arith.muli %c1_i32, %c8_i32_21 : i32
    %39 = tpu.assume_multiple %38, 8 : i32
    %40 = arith.index_cast %39 : i32 to index
    %c0_22 = arith.constant 0 : index
    %41 = vector.load %arg15[%40, %c0_22] : memref<64x128xf32, #tpu.memory_space<vmem>>, vector<8x128xf32>
    %cst_23 = arith.constant dense<0.000000e+00> : vector<8x128xf32>
    %42 = tpu.matmul %35, %1, %cst_23 {dimension_numbers = #tpu.dot_dimension_numbers<[1], [0], [0], [1], [0, 0, 1, 1], [], []>} : vector<8x32xf32>, vector<32x128xf32>, vector<8x128xf32> -> vector<8x128xf32>
    %43 = arith.addf %41, %42 : vector<8x128xf32>
    %44 = arith.negf %43 : vector<8x128xf32>
    %45 = math.exp %44 : vector<8x128xf32>
    %cst_24 = arith.constant 1.000000e+00 : f32
    %46 = vector.broadcast %cst_24 : f32 to vector<8x128xf32>
    %47 = arith.addf %46, %45 : vector<8x128xf32>
    %48 = arith.divf %46, %47 : vector<8x128xf32>
    %49 = vector.extract_strided_slice %48 {offsets = [0, 0], sizes = [8, 32], strides = [1, 1]} : vector<8x128xf32> to vector<8x32xf32>
    %50 = vector.extract_strided_slice %48 {offsets = [0, 32], sizes = [8, 32], strides = [1, 1]} : vector<8x128xf32> to vector<8x32xf32>
    %51 = vector.extract_strided_slice %48 {offsets = [0, 64], sizes = [8, 32], strides = [1, 1]} : vector<8x128xf32> to vector<8x32xf32>
    %cst_25 = arith.constant 2.000000e+00 : f32
    %52 = vector.broadcast %cst_25 : f32 to vector<8x32xf32>
    %53 = arith.mulf %52, %51 : vector<8x32xf32>
    %cst_26 = arith.constant 1.000000e+00 : f32
    %54 = vector.broadcast %cst_26 : f32 to vector<8x32xf32>
    %55 = arith.subf %53, %54 : vector<8x32xf32>
    %56 = vector.extract_strided_slice %48 {offsets = [0, 96], sizes = [8, 32], strides = [1, 1]} : vector<8x128xf32> to vector<8x32xf32>
    %57 = arith.mulf %50, %33 : vector<8x32xf32>
    %58 = arith.mulf %49, %55 : vector<8x32xf32>
    %59 = arith.addf %57, %58 : vector<8x32xf32>
    %60 = math.tanh %59 : vector<8x32xf32>
    %61 = arith.mulf %56, %60 : vector<8x32xf32>
    %62 = arith.index_cast %39 : i32 to index
    %c0_27 = arith.constant 0 : index
    %63 = vector.load %arg14[%62, %c0_27] : memref<64x32xf32, #tpu.memory_space<vmem>>, vector<8x32xf32>
    tpu.vector_store %arg14[%62, %c0_27], %61 {strides = array<i32>} : memref<64x32xf32, #tpu.memory_space<vmem>>, vector<8x32xf32>,
    %c2_i32 = arith.constant 2 : i32
    %c8_i32_28 = arith.constant 8 : i32
    %64 = arith.muli %c2_i32, %c8_i32_28 : i32
    %65 = tpu.assume_multiple %64, 8 : i32
    %66 = arith.index_cast %65 : i32 to index
    %c0_29 = arith.constant 0 : index
    %67 = vector.load %arg15[%66, %c0_29] : memref<64x128xf32, #tpu.memory_space<vmem>>, vector<8x128xf32>
    %cst_30 = arith.constant dense<0.000000e+00> : vector<8x128xf32>
    %68 = tpu.matmul %61, %1, %cst_30 {dimension_numbers = #tpu.dot_dimension_numbers<[1], [0], [0], [1], [0, 0, 1, 1], [], []>} : vector<8x32xf32>, vector<32x128xf32>, vector<8x128xf32> -> vector<8x128xf32>
    %69 = arith.addf %67, %68 : vector<8x128xf32>
    %70 = arith.negf %69 : vector<8x128xf32>
    %71 = math.exp %70 : vector<8x128xf32>
    %cst_31 = arith.constant 1.000000e+00 : f32
    %72 = vector.broadcast %cst_31 : f32 to vector<8x128xf32>
    %73 = arith.addf %72, %71 : vector<8x128xf32>
    %74 = arith.divf %72, %73 : vector<8x128xf32>
    %75 = vector.extract_strided_slice %74 {offsets = [0, 0], sizes = [8, 32], strides = [1, 1]} : vector<8x128xf32> to vector<8x32xf32>
    %76 = vector.extract_strided_slice %74 {offsets = [0, 32], sizes = [8, 32], strides = [1, 1]} : vector<8x128xf32> to vector<8x32xf32>
    %77 = vector.extract_strided_slice %74 {offsets = [0, 64], sizes = [8, 32], strides = [1, 1]} : vector<8x128xf32> to vector<8x32xf32>
    %cst_32 = arith.constant 2.000000e+00 : f32
    %78 = vector.broadcast %cst_32 : f32 to vector<8x32xf32>
    %79 = arith.mulf %78, %77 : vector<8x32xf32>
    %cst_33 = arith.constant 1.000000e+00 : f32
    %80 = vector.broadcast %cst_33 : f32 to vector<8x32xf32>
    %81 = arith.subf %79, %80 : vector<8x32xf32>
    %82 = vector.extract_strided_slice %74 {offsets = [0, 96], sizes = [8, 32], strides = [1, 1]} : vector<8x128xf32> to vector<8x32xf32>
    %83 = arith.mulf %76, %59 : vector<8x32xf32>
    %84 = arith.mulf %75, %81 : vector<8x32xf32>
    %85 = arith.addf %83, %84 : vector<8x32xf32>
    %86 = math.tanh %85 : vector<8x32xf32>
    %87 = arith.mulf %82, %86 : vector<8x32xf32>
    %88 = arith.index_cast %65 : i32 to index
    %c0_34 = arith.constant 0 : index
    %89 = vector.load %arg14[%88, %c0_34] : memref<64x32xf32, #tpu.memory_space<vmem>>, vector<8x32xf32>
    tpu.vector_store %arg14[%88, %c0_34], %87 {strides = array<i32>} : memref<64x32xf32, #tpu.memory_space<vmem>>, vector<8x32xf32>,
    %c3_i32 = arith.constant 3 : i32
    %c8_i32_35 = arith.constant 8 : i32
    %90 = arith.muli %c3_i32, %c8_i32_35 : i32
    %91 = tpu.assume_multiple %90, 8 : i32
    %92 = arith.index_cast %91 : i32 to index
    %c0_36 = arith.constant 0 : index
    %93 = vector.load %arg15[%92, %c0_36] : memref<64x128xf32, #tpu.memory_space<vmem>>, vector<8x128xf32>
    %cst_37 = arith.constant dense<0.000000e+00> : vector<8x128xf32>
    %94 = tpu.matmul %87, %1, %cst_37 {dimension_numbers = #tpu.dot_dimension_numbers<[1], [0], [0], [1], [0, 0, 1, 1], [], []>} : vector<8x32xf32>, vector<32x128xf32>, vector<8x128xf32> -> vector<8x128xf32>
    %95 = arith.addf %93, %94 : vector<8x128xf32>
    %96 = arith.negf %95 : vector<8x128xf32>
    %97 = math.exp %96 : vector<8x128xf32>
    %cst_38 = arith.constant 1.000000e+00 : f32
    %98 = vector.broadcast %cst_38 : f32 to vector<8x128xf32>
    %99 = arith.addf %98, %97 : vector<8x128xf32>
    %100 = arith.divf %98, %99 : vector<8x128xf32>
    %101 = vector.extract_strided_slice %100 {offsets = [0, 0], sizes = [8, 32], strides = [1, 1]} : vector<8x128xf32> to vector<8x32xf32>
    %102 = vector.extract_strided_slice %100 {offsets = [0, 32], sizes = [8, 32], strides = [1, 1]} : vector<8x128xf32> to vector<8x32xf32>
    %103 = vector.extract_strided_slice %100 {offsets = [0, 64], sizes = [8, 32], strides = [1, 1]} : vector<8x128xf32> to vector<8x32xf32>
    %cst_39 = arith.constant 2.000000e+00 : f32
    %104 = vector.broadcast %cst_39 : f32 to vector<8x32xf32>
    %105 = arith.mulf %104, %103 : vector<8x32xf32>
    %cst_40 = arith.constant 1.000000e+00 : f32
    %106 = vector.broadcast %cst_40 : f32 to vector<8x32xf32>
    %107 = arith.subf %105, %106 : vector<8x32xf32>
    %108 = vector.extract_strided_slice %100 {offsets = [0, 96], sizes = [8, 32], strides = [1, 1]} : vector<8x128xf32> to vector<8x32xf32>
    %109 = arith.mulf %102, %85 : vector<8x32xf32>
    %110 = arith.mulf %101, %107 : vector<8x32xf32>
    %111 = arith.addf %109, %110 : vector<8x32xf32>
    %112 = math.tanh %111 : vector<8x32xf32>
    %113 = arith.mulf %108, %112 : vector<8x32xf32>
    %114 = arith.index_cast %91 : i32 to index
    %c0_41 = arith.constant 0 : index
    %115 = vector.load %arg14[%114, %c0_41] : memref<64x32xf32, #tpu.memory_space<vmem>>, vector<8x32xf32>
    tpu.vector_store %arg14[%114, %c0_41], %113 {strides = array<i32>} : memref<64x32xf32, #tpu.memory_space<vmem>>, vector<8x32xf32>,
    %c4_i32 = arith.constant 4 : i32
    %c8_i32_42 = arith.constant 8 : i32
    %116 = arith.muli %c4_i32, %c8_i32_42 : i32
    %117 = tpu.assume_multiple %116, 8 : i32
    %118 = arith.index_cast %117 : i32 to index
    %c0_43 = arith.constant 0 : index
    %119 = vector.load %arg15[%118, %c0_43] : memref<64x128xf32, #tpu.memory_space<vmem>>, vector<8x128xf32>
    %cst_44 = arith.constant dense<0.000000e+00> : vector<8x128xf32>
    %120 = tpu.matmul %113, %1, %cst_44 {dimension_numbers = #tpu.dot_dimension_numbers<[1], [0], [0], [1], [0, 0, 1, 1], [], []>} : vector<8x32xf32>, vector<32x128xf32>, vector<8x128xf32> -> vector<8x128xf32>
    %121 = arith.addf %119, %120 : vector<8x128xf32>
    %122 = arith.negf %121 : vector<8x128xf32>
    %123 = math.exp %122 : vector<8x128xf32>
    %cst_45 = arith.constant 1.000000e+00 : f32
    %124 = vector.broadcast %cst_45 : f32 to vector<8x128xf32>
    %125 = arith.addf %124, %123 : vector<8x128xf32>
    %126 = arith.divf %124, %125 : vector<8x128xf32>
    %127 = vector.extract_strided_slice %126 {offsets = [0, 0], sizes = [8, 32], strides = [1, 1]} : vector<8x128xf32> to vector<8x32xf32>
    %128 = vector.extract_strided_slice %126 {offsets = [0, 32], sizes = [8, 32], strides = [1, 1]} : vector<8x128xf32> to vector<8x32xf32>
    %129 = vector.extract_strided_slice %126 {offsets = [0, 64], sizes = [8, 32], strides = [1, 1]} : vector<8x128xf32> to vector<8x32xf32>
    %cst_46 = arith.constant 2.000000e+00 : f32
    %130 = vector.broadcast %cst_46 : f32 to vector<8x32xf32>
    %131 = arith.mulf %130, %129 : vector<8x32xf32>
    %cst_47 = arith.constant 1.000000e+00 : f32
    %132 = vector.broadcast %cst_47 : f32 to vector<8x32xf32>
    %133 = arith.subf %131, %132 : vector<8x32xf32>
    %134 = vector.extract_strided_slice %126 {offsets = [0, 96], sizes = [8, 32], strides = [1, 1]} : vector<8x128xf32> to vector<8x32xf32>
    %135 = arith.mulf %128, %111 : vector<8x32xf32>
    %136 = arith.mulf %127, %133 : vector<8x32xf32>
    %137 = arith.addf %135, %136 : vector<8x32xf32>
    %138 = math.tanh %137 : vector<8x32xf32>
    %139 = arith.mulf %134, %138 : vector<8x32xf32>
    %140 = arith.index_cast %117 : i32 to index
    %c0_48 = arith.constant 0 : index
    %141 = vector.load %arg14[%140, %c0_48] : memref<64x32xf32, #tpu.memory_space<vmem>>, vector<8x32xf32>
    tpu.vector_store %arg14[%140, %c0_48], %139 {strides = array<i32>} : memref<64x32xf32, #tpu.memory_space<vmem>>, vector<8x32xf32>,
    %c5_i32 = arith.constant 5 : i32
    %c8_i32_49 = arith.constant 8 : i32
    %142 = arith.muli %c5_i32, %c8_i32_49 : i32
    %143 = tpu.assume_multiple %142, 8 : i32
    %144 = arith.index_cast %143 : i32 to index
    %c0_50 = arith.constant 0 : index
    %145 = vector.load %arg15[%144, %c0_50] : memref<64x128xf32, #tpu.memory_space<vmem>>, vector<8x128xf32>
    %cst_51 = arith.constant dense<0.000000e+00> : vector<8x128xf32>
    %146 = tpu.matmul %139, %1, %cst_51 {dimension_numbers = #tpu.dot_dimension_numbers<[1], [0], [0], [1], [0, 0, 1, 1], [], []>} : vector<8x32xf32>, vector<32x128xf32>, vector<8x128xf32> -> vector<8x128xf32>
    %147 = arith.addf %145, %146 : vector<8x128xf32>
    %148 = arith.negf %147 : vector<8x128xf32>
    %149 = math.exp %148 : vector<8x128xf32>
    %cst_52 = arith.constant 1.000000e+00 : f32
    %150 = vector.broadcast %cst_52 : f32 to vector<8x128xf32>
    %151 = arith.addf %150, %149 : vector<8x128xf32>
    %152 = arith.divf %150, %151 : vector<8x128xf32>
    %153 = vector.extract_strided_slice %152 {offsets = [0, 0], sizes = [8, 32], strides = [1, 1]} : vector<8x128xf32> to vector<8x32xf32>
    %154 = vector.extract_strided_slice %152 {offsets = [0, 32], sizes = [8, 32], strides = [1, 1]} : vector<8x128xf32> to vector<8x32xf32>
    %155 = vector.extract_strided_slice %152 {offsets = [0, 64], sizes = [8, 32], strides = [1, 1]} : vector<8x128xf32> to vector<8x32xf32>
    %cst_53 = arith.constant 2.000000e+00 : f32
    %156 = vector.broadcast %cst_53 : f32 to vector<8x32xf32>
    %157 = arith.mulf %156, %155 : vector<8x32xf32>
    %cst_54 = arith.constant 1.000000e+00 : f32
    %158 = vector.broadcast %cst_54 : f32 to vector<8x32xf32>
    %159 = arith.subf %157, %158 : vector<8x32xf32>
    %160 = vector.extract_strided_slice %152 {offsets = [0, 96], sizes = [8, 32], strides = [1, 1]} : vector<8x128xf32> to vector<8x32xf32>
    %161 = arith.mulf %154, %137 : vector<8x32xf32>
    %162 = arith.mulf %153, %159 : vector<8x32xf32>
    %163 = arith.addf %161, %162 : vector<8x32xf32>
    %164 = math.tanh %163 : vector<8x32xf32>
    %165 = arith.mulf %160, %164 : vector<8x32xf32>
    %166 = arith.index_cast %143 : i32 to index
    %c0_55 = arith.constant 0 : index
    %167 = vector.load %arg14[%166, %c0_55] : memref<64x32xf32, #tpu.memory_space<vmem>>, vector<8x32xf32>
    tpu.vector_store %arg14[%166, %c0_55], %165 {strides = array<i32>} : memref<64x32xf32, #tpu.memory_space<vmem>>, vector<8x32xf32>,
    %c6_i32 = arith.constant 6 : i32
    %c8_i32_56 = arith.constant 8 : i32
    %168 = arith.muli %c6_i32, %c8_i32_56 : i32
    %169 = tpu.assume_multiple %168, 8 : i32
    %170 = arith.index_cast %169 : i32 to index
    %c0_57 = arith.constant 0 : index
    %171 = vector.load %arg15[%170, %c0_57] : memref<64x128xf32, #tpu.memory_space<vmem>>, vector<8x128xf32>
    %cst_58 = arith.constant dense<0.000000e+00> : vector<8x128xf32>
    %172 = tpu.matmul %165, %1, %cst_58 {dimension_numbers = #tpu.dot_dimension_numbers<[1], [0], [0], [1], [0, 0, 1, 1], [], []>} : vector<8x32xf32>, vector<32x128xf32>, vector<8x128xf32> -> vector<8x128xf32>
    %173 = arith.addf %171, %172 : vector<8x128xf32>
    %174 = arith.negf %173 : vector<8x128xf32>
    %175 = math.exp %174 : vector<8x128xf32>
    %cst_59 = arith.constant 1.000000e+00 : f32
    %176 = vector.broadcast %cst_59 : f32 to vector<8x128xf32>
    %177 = arith.addf %176, %175 : vector<8x128xf32>
    %178 = arith.divf %176, %177 : vector<8x128xf32>
    %179 = vector.extract_strided_slice %178 {offsets = [0, 0], sizes = [8, 32], strides = [1, 1]} : vector<8x128xf32> to vector<8x32xf32>
    %180 = vector.extract_strided_slice %178 {offsets = [0, 32], sizes = [8, 32], strides = [1, 1]} : vector<8x128xf32> to vector<8x32xf32>
    %181 = vector.extract_strided_slice %178 {offsets = [0, 64], sizes = [8, 32], strides = [1, 1]} : vector<8x128xf32> to vector<8x32xf32>
    %cst_60 = arith.constant 2.000000e+00 : f32
    %182 = vector.broadcast %cst_60 : f32 to vector<8x32xf32>
    %183 = arith.mulf %182, %181 : vector<8x32xf32>
    %cst_61 = arith.constant 1.000000e+00 : f32
    %184 = vector.broadcast %cst_61 : f32 to vector<8x32xf32>
    %185 = arith.subf %183, %184 : vector<8x32xf32>
    %186 = vector.extract_strided_slice %178 {offsets = [0, 96], sizes = [8, 32], strides = [1, 1]} : vector<8x128xf32> to vector<8x32xf32>
    %187 = arith.mulf %180, %163 : vector<8x32xf32>
    %188 = arith.mulf %179, %185 : vector<8x32xf32>
    %189 = arith.addf %187, %188 : vector<8x32xf32>
    %190 = math.tanh %189 : vector<8x32xf32>
    %191 = arith.mulf %186, %190 : vector<8x32xf32>
    %192 = arith.index_cast %169 : i32 to index
    %c0_62 = arith.constant 0 : index
    %193 = vector.load %arg14[%192, %c0_62] : memref<64x32xf32, #tpu.memory_space<vmem>>, vector<8x32xf32>
    tpu.vector_store %arg14[%192, %c0_62], %191 {strides = array<i32>} : memref<64x32xf32, #tpu.memory_space<vmem>>, vector<8x32xf32>,
    %c7_i32 = arith.constant 7 : i32
    %c8_i32_63 = arith.constant 8 : i32
    %194 = arith.muli %c7_i32, %c8_i32_63 : i32
    %195 = tpu.assume_multiple %194, 8 : i32
    %196 = arith.index_cast %195 : i32 to index
    %c0_64 = arith.constant 0 : index
    %197 = vector.load %arg15[%196, %c0_64] : memref<64x128xf32, #tpu.memory_space<vmem>>, vector<8x128xf32>
    %cst_65 = arith.constant dense<0.000000e+00> : vector<8x128xf32>
    %198 = tpu.matmul %191, %1, %cst_65 {dimension_numbers = #tpu.dot_dimension_numbers<[1], [0], [0], [1], [0, 0, 1, 1], [], []>} : vector<8x32xf32>, vector<32x128xf32>, vector<8x128xf32> -> vector<8x128xf32>
    %199 = arith.addf %197, %198 : vector<8x128xf32>
    %200 = arith.negf %199 : vector<8x128xf32>
    %201 = math.exp %200 : vector<8x128xf32>
    %cst_66 = arith.constant 1.000000e+00 : f32
    %202 = vector.broadcast %cst_66 : f32 to vector<8x128xf32>
    %203 = arith.addf %202, %201 : vector<8x128xf32>
    %204 = arith.divf %202, %203 : vector<8x128xf32>
    %205 = vector.extract_strided_slice %204 {offsets = [0, 0], sizes = [8, 32], strides = [1, 1]} : vector<8x128xf32> to vector<8x32xf32>
    %206 = vector.extract_strided_slice %204 {offsets = [0, 32], sizes = [8, 32], strides = [1, 1]} : vector<8x128xf32> to vector<8x32xf32>
    %207 = vector.extract_strided_slice %204 {offsets = [0, 64], sizes = [8, 32], strides = [1, 1]} : vector<8x128xf32> to vector<8x32xf32>
    %cst_67 = arith.constant 2.000000e+00 : f32
    %208 = vector.broadcast %cst_67 : f32 to vector<8x32xf32>
    %209 = arith.mulf %208, %207 : vector<8x32xf32>
    %cst_68 = arith.constant 1.000000e+00 : f32
    %210 = vector.broadcast %cst_68 : f32 to vector<8x32xf32>
    %211 = arith.subf %209, %210 : vector<8x32xf32>
    %212 = vector.extract_strided_slice %204 {offsets = [0, 96], sizes = [8, 32], strides = [1, 1]} : vector<8x128xf32> to vector<8x32xf32>
    %213 = arith.mulf %206, %189 : vector<8x32xf32>
    %214 = arith.mulf %205, %211 : vector<8x32xf32>
    %215 = arith.addf %213, %214 : vector<8x32xf32>
    %216 = math.tanh %215 : vector<8x32xf32>
    %217 = arith.mulf %212, %216 : vector<8x32xf32>
    %218 = arith.index_cast %195 : i32 to index
    %c0_69 = arith.constant 0 : index
    %219 = vector.load %arg14[%218, %c0_69] : memref<64x32xf32, #tpu.memory_space<vmem>>, vector<8x32xf32>
    tpu.vector_store %arg14[%218, %c0_69], %217 {strides = array<i32>} : memref<64x32xf32, #tpu.memory_space<vmem>>, vector<8x32xf32>,
    %c8_i32_70 = arith.constant 8 : i32
    %c0_71 = arith.constant 0 : index
    %c0_72 = arith.constant 0 : index
    %c0_73 = arith.constant 0 : index
    %220 = vector.load %arg11[%c0_71, %c0_72, %c0_73] : memref<2x8x32xf32, #tpu.memory_space<vmem>>, vector<1x8x32xf32>
    %221 = vector.shape_cast %220 : vector<1x8x32xf32> to vector<8x32xf32>
    %222 = vector.shape_cast %217 : vector<8x32xf32> to vector<1x8x32xf32>
    tpu.vector_store %arg11[%c0_71, %c0_72, %c0_73], %222 {strides = array<i32>} : memref<2x8x32xf32, #tpu.memory_space<vmem>>, vector<1x8x32xf32>,
    %c0_74 = arith.constant 0 : index
    %c0_75 = arith.constant 0 : index
    %c0_76 = arith.constant 0 : index
    %223 = vector.load %arg12[%c0_74, %c0_75, %c0_76] : memref<2x8x32xf32, #tpu.memory_space<vmem>>, vector<1x8x32xf32>
    %224 = vector.shape_cast %223 : vector<1x8x32xf32> to vector<8x32xf32>
    %225 = vector.shape_cast %215 : vector<8x32xf32> to vector<1x8x32xf32>
    tpu.vector_store %arg12[%c0_74, %c0_75, %c0_76], %225 {strides = array<i32>} : memref<2x8x32xf32, #tpu.memory_space<vmem>>, vector<1x8x32xf32>,
    %c0_77 = arith.constant 0 : index
    %c0_78 = arith.constant 0 : index
    %226 = vector.load %arg6[%c0_77, %c0_78] : memref<32x128xf32, #tpu.memory_space<vmem>>, vector<32x128xf32>
    %c0_79 = arith.constant 0 : index
    %c0_80 = arith.constant 0 : index
    %227 = vector.load %arg7[%c0_79, %c0_80] : memref<32x128xf32, #tpu.memory_space<vmem>>, vector<32x128xf32>
    %c0_81 = arith.constant 0 : index
    %c0_82 = arith.constant 0 : index
    %228 = vector.load %arg8[%c0_81, %c0_82] : memref<1x128xf32, #tpu.memory_space<vmem>>, vector<1x128xf32>
    %c0_83 = arith.constant 0 : index
    %c0_84 = arith.constant 0 : index
    %229 = vector.load %arg14[%c0_83, %c0_84] : memref<64x32xf32, #tpu.memory_space<vmem>>, vector<64x32xf32>
    %cst_85 = arith.constant dense<0.000000e+00> : vector<64x128xf32>
    %230 = tpu.matmul %229, %226, %cst_85 {dimension_numbers = #tpu.dot_dimension_numbers<[1], [0], [0], [1], [0, 0, 1, 1], [], []>} : vector<64x32xf32>, vector<32x128xf32>, vector<64x128xf32> -> vector<64x128xf32>
    %231 = vector.broadcast %228 : vector<1x128xf32> to vector<64x128xf32>
    %232 = arith.addf %230, %231 : vector<64x128xf32>
    %c0_86 = arith.constant 0 : index
    %c0_87 = arith.constant 0 : index
    %233 = vector.load %arg15[%c0_86, %c0_87] : memref<64x128xf32, #tpu.memory_space<vmem>>, vector<64x128xf32>
    tpu.vector_store %arg15[%c0_86, %c0_87], %232 {strides = array<i32>} : memref<64x128xf32, #tpu.memory_space<vmem>>, vector<64x128xf32>,
    %c1 = arith.constant 1 : index
    %c0_88 = arith.constant 0 : index
    %c0_89 = arith.constant 0 : index
    %234 = vector.load %arg1[%c1, %c0_88, %c0_89] : memref<2x8x32xf32, #tpu.memory_space<vmem>>, vector<1x8x32xf32>
    %235 = vector.shape_cast %234 : vector<1x8x32xf32> to vector<8x32xf32>
    %c1_90 = arith.constant 1 : index
    %c0_91 = arith.constant 0 : index
    %c0_92 = arith.constant 0 : index
    %236 = vector.load %arg2[%c1_90, %c0_91, %c0_92] : memref<2x8x32xf32, #tpu.memory_space<vmem>>, vector<1x8x32xf32>
    %237 = vector.shape_cast %236 : vector<1x8x32xf32> to vector<8x32xf32>
    %c0_i32_93 = arith.constant 0 : i32
    %c8_i32_94 = arith.constant 8 : i32
    %238 = arith.muli %c0_i32_93, %c8_i32_94 : i32
    %239 = tpu.assume_multiple %238, 8 : i32
    %240 = arith.index_cast %239 : i32 to index
    %c0_95 = arith.constant 0 : index
    %241 = vector.load %arg15[%240, %c0_95] : memref<64x128xf32, #tpu.memory_space<vmem>>, vector<8x128xf32>
    %cst_96 = arith.constant dense<0.000000e+00> : vector<8x128xf32>
    %242 = tpu.matmul %235, %227, %cst_96 {dimension_numbers = #tpu.dot_dimension_numbers<[1], [0], [0], [1], [0, 0, 1, 1], [], []>} : vector<8x32xf32>, vector<32x128xf32>, vector<8x128xf32> -> vector<8x128xf32>
    %243 = arith.addf %241, %242 : vector<8x128xf32>
    %244 = arith.negf %243 : vector<8x128xf32>
    %245 = math.exp %244 : vector<8x128xf32>
    %cst_97 = arith.constant 1.000000e+00 : f32
    %246 = vector.broadcast %cst_97 : f32 to vector<8x128xf32>
    %247 = arith.addf %246, %245 : vector<8x128xf32>
    %248 = arith.divf %246, %247 : vector<8x128xf32>
    %249 = vector.extract_strided_slice %248 {offsets = [0, 0], sizes = [8, 32], strides = [1, 1]} : vector<8x128xf32> to vector<8x32xf32>
    %250 = vector.extract_strided_slice %248 {offsets = [0, 32], sizes = [8, 32], strides = [1, 1]} : vector<8x128xf32> to vector<8x32xf32>
    %251 = vector.extract_strided_slice %248 {offsets = [0, 64], sizes = [8, 32], strides = [1, 1]} : vector<8x128xf32> to vector<8x32xf32>
    %cst_98 = arith.constant 2.000000e+00 : f32
    %252 = vector.broadcast %cst_98 : f32 to vector<8x32xf32>
    %253 = arith.mulf %252, %251 : vector<8x32xf32>
    %cst_99 = arith.constant 1.000000e+00 : f32
    %254 = vector.broadcast %cst_99 : f32 to vector<8x32xf32>
    %255 = arith.subf %253, %254 : vector<8x32xf32>
    %256 = vector.extract_strided_slice %248 {offsets = [0, 96], sizes = [8, 32], strides = [1, 1]} : vector<8x128xf32> to vector<8x32xf32>
    %257 = arith.mulf %250, %237 : vector<8x32xf32>
    %258 = arith.mulf %249, %255 : vector<8x32xf32>
    %259 = arith.addf %257, %258 : vector<8x32xf32>
    %260 = math.tanh %259 : vector<8x32xf32>
    %261 = arith.mulf %256, %260 : vector<8x32xf32>
    %c1_i32_100 = arith.constant 1 : i32
    %c8_i32_101 = arith.constant 8 : i32
    %262 = arith.muli %c1_i32_100, %c8_i32_101 : i32
    %263 = tpu.assume_multiple %262, 8 : i32
    %264 = arith.index_cast %263 : i32 to index
    %c0_102 = arith.constant 0 : index
    %265 = vector.load %arg15[%264, %c0_102] : memref<64x128xf32, #tpu.memory_space<vmem>>, vector<8x128xf32>
    %cst_103 = arith.constant dense<0.000000e+00> : vector<8x128xf32>
    %266 = tpu.matmul %261, %227, %cst_103 {dimension_numbers = #tpu.dot_dimension_numbers<[1], [0], [0], [1], [0, 0, 1, 1], [], []>} : vector<8x32xf32>, vector<32x128xf32>, vector<8x128xf32> -> vector<8x128xf32>
    %267 = arith.addf %265, %266 : vector<8x128xf32>
    %268 = arith.negf %267 : vector<8x128xf32>
    %269 = math.exp %268 : vector<8x128xf32>
    %cst_104 = arith.constant 1.000000e+00 : f32
    %270 = vector.broadcast %cst_104 : f32 to vector<8x128xf32>
    %271 = arith.addf %270, %269 : vector<8x128xf32>
    %272 = arith.divf %270, %271 : vector<8x128xf32>
    %273 = vector.extract_strided_slice %272 {offsets = [0, 0], sizes = [8, 32], strides = [1, 1]} : vector<8x128xf32> to vector<8x32xf32>
    %274 = vector.extract_strided_slice %272 {offsets = [0, 32], sizes = [8, 32], strides = [1, 1]} : vector<8x128xf32> to vector<8x32xf32>
    %275 = vector.extract_strided_slice %272 {offsets = [0, 64], sizes = [8, 32], strides = [1, 1]} : vector<8x128xf32> to vector<8x32xf32>
    %cst_105 = arith.constant 2.000000e+00 : f32
    %276 = vector.broadcast %cst_105 : f32 to vector<8x32xf32>
    %277 = arith.mulf %276, %275 : vector<8x32xf32>
    %cst_106 = arith.constant 1.000000e+00 : f32
    %278 = vector.broadcast %cst_106 : f32 to vector<8x32xf32>
    %279 = arith.subf %277, %278 : vector<8x32xf32>
    %280 = vector.extract_strided_slice %272 {offsets = [0, 96], sizes = [8, 32], strides = [1, 1]} : vector<8x128xf32> to vector<8x32xf32>
    %281 = arith.mulf %274, %259 : vector<8x32xf32>
    %282 = arith.mulf %273, %279 : vector<8x32xf32>
    %283 = arith.addf %281, %282 : vector<8x32xf32>
    %284 = math.tanh %283 : vector<8x32xf32>
    %285 = arith.mulf %280, %284 : vector<8x32xf32>
    %c2_i32_107 = arith.constant 2 : i32
    %c8_i32_108 = arith.constant 8 : i32
    %286 = arith.muli %c2_i32_107, %c8_i32_108 : i32
    %287 = tpu.assume_multiple %286, 8 : i32
    %288 = arith.index_cast %287 : i32 to index
    %c0_109 = arith.constant 0 : index
    %289 = vector.load %arg15[%288, %c0_109] : memref<64x128xf32, #tpu.memory_space<vmem>>, vector<8x128xf32>
    %cst_110 = arith.constant dense<0.000000e+00> : vector<8x128xf32>
    %290 = tpu.matmul %285, %227, %cst_110 {dimension_numbers = #tpu.dot_dimension_numbers<[1], [0], [0], [1], [0, 0, 1, 1], [], []>} : vector<8x32xf32>, vector<32x128xf32>, vector<8x128xf32> -> vector<8x128xf32>
    %291 = arith.addf %289, %290 : vector<8x128xf32>
    %292 = arith.negf %291 : vector<8x128xf32>
    %293 = math.exp %292 : vector<8x128xf32>
    %cst_111 = arith.constant 1.000000e+00 : f32
    %294 = vector.broadcast %cst_111 : f32 to vector<8x128xf32>
    %295 = arith.addf %294, %293 : vector<8x128xf32>
    %296 = arith.divf %294, %295 : vector<8x128xf32>
    %297 = vector.extract_strided_slice %296 {offsets = [0, 0], sizes = [8, 32], strides = [1, 1]} : vector<8x128xf32> to vector<8x32xf32>
    %298 = vector.extract_strided_slice %296 {offsets = [0, 32], sizes = [8, 32], strides = [1, 1]} : vector<8x128xf32> to vector<8x32xf32>
    %299 = vector.extract_strided_slice %296 {offsets = [0, 64], sizes = [8, 32], strides = [1, 1]} : vector<8x128xf32> to vector<8x32xf32>
    %cst_112 = arith.constant 2.000000e+00 : f32
    %300 = vector.broadcast %cst_112 : f32 to vector<8x32xf32>
    %301 = arith.mulf %300, %299 : vector<8x32xf32>
    %cst_113 = arith.constant 1.000000e+00 : f32
    %302 = vector.broadcast %cst_113 : f32 to vector<8x32xf32>
    %303 = arith.subf %301, %302 : vector<8x32xf32>
    %304 = vector.extract_strided_slice %296 {offsets = [0, 96], sizes = [8, 32], strides = [1, 1]} : vector<8x128xf32> to vector<8x32xf32>
    %305 = arith.mulf %298, %283 : vector<8x32xf32>
    %306 = arith.mulf %297, %303 : vector<8x32xf32>
    %307 = arith.addf %305, %306 : vector<8x32xf32>
    %308 = math.tanh %307 : vector<8x32xf32>
    %309 = arith.mulf %304, %308 : vector<8x32xf32>
    %c3_i32_114 = arith.constant 3 : i32
    %c8_i32_115 = arith.constant 8 : i32
    %310 = arith.muli %c3_i32_114, %c8_i32_115 : i32
    %311 = tpu.assume_multiple %310, 8 : i32
    %312 = arith.index_cast %311 : i32 to index
    %c0_116 = arith.constant 0 : index
    %313 = vector.load %arg15[%312, %c0_116] : memref<64x128xf32, #tpu.memory_space<vmem>>, vector<8x128xf32>
    %cst_117 = arith.constant dense<0.000000e+00> : vector<8x128xf32>
    %314 = tpu.matmul %309, %227, %cst_117 {dimension_numbers = #tpu.dot_dimension_numbers<[1], [0], [0], [1], [0, 0, 1, 1], [], []>} : vector<8x32xf32>, vector<32x128xf32>, vector<8x128xf32> -> vector<8x128xf32>
    %315 = arith.addf %313, %314 : vector<8x128xf32>
    %316 = arith.negf %315 : vector<8x128xf32>
    %317 = math.exp %316 : vector<8x128xf32>
    %cst_118 = arith.constant 1.000000e+00 : f32
    %318 = vector.broadcast %cst_118 : f32 to vector<8x128xf32>
    %319 = arith.addf %318, %317 : vector<8x128xf32>
    %320 = arith.divf %318, %319 : vector<8x128xf32>
    %321 = vector.extract_strided_slice %320 {offsets = [0, 0], sizes = [8, 32], strides = [1, 1]} : vector<8x128xf32> to vector<8x32xf32>
    %322 = vector.extract_strided_slice %320 {offsets = [0, 32], sizes = [8, 32], strides = [1, 1]} : vector<8x128xf32> to vector<8x32xf32>
    %323 = vector.extract_strided_slice %320 {offsets = [0, 64], sizes = [8, 32], strides = [1, 1]} : vector<8x128xf32> to vector<8x32xf32>
    %cst_119 = arith.constant 2.000000e+00 : f32
    %324 = vector.broadcast %cst_119 : f32 to vector<8x32xf32>
    %325 = arith.mulf %324, %323 : vector<8x32xf32>
    %cst_120 = arith.constant 1.000000e+00 : f32
    %326 = vector.broadcast %cst_120 : f32 to vector<8x32xf32>
    %327 = arith.subf %325, %326 : vector<8x32xf32>
    %328 = vector.extract_strided_slice %320 {offsets = [0, 96], sizes = [8, 32], strides = [1, 1]} : vector<8x128xf32> to vector<8x32xf32>
    %329 = arith.mulf %322, %307 : vector<8x32xf32>
    %330 = arith.mulf %321, %327 : vector<8x32xf32>
    %331 = arith.addf %329, %330 : vector<8x32xf32>
    %332 = math.tanh %331 : vector<8x32xf32>
    %333 = arith.mulf %328, %332 : vector<8x32xf32>
    %c4_i32_121 = arith.constant 4 : i32
    %c8_i32_122 = arith.constant 8 : i32
    %334 = arith.muli %c4_i32_121, %c8_i32_122 : i32
    %335 = tpu.assume_multiple %334, 8 : i32
    %336 = arith.index_cast %335 : i32 to index
    %c0_123 = arith.constant 0 : index
    %337 = vector.load %arg15[%336, %c0_123] : memref<64x128xf32, #tpu.memory_space<vmem>>, vector<8x128xf32>
    %cst_124 = arith.constant dense<0.000000e+00> : vector<8x128xf32>
    %338 = tpu.matmul %333, %227, %cst_124 {dimension_numbers = #tpu.dot_dimension_numbers<[1], [0], [0], [1], [0, 0, 1, 1], [], []>} : vector<8x32xf32>, vector<32x128xf32>, vector<8x128xf32> -> vector<8x128xf32>
    %339 = arith.addf %337, %338 : vector<8x128xf32>
    %340 = arith.negf %339 : vector<8x128xf32>
    %341 = math.exp %340 : vector<8x128xf32>
    %cst_125 = arith.constant 1.000000e+00 : f32
    %342 = vector.broadcast %cst_125 : f32 to vector<8x128xf32>
    %343 = arith.addf %342, %341 : vector<8x128xf32>
    %344 = arith.divf %342, %343 : vector<8x128xf32>
    %345 = vector.extract_strided_slice %344 {offsets = [0, 0], sizes = [8, 32], strides = [1, 1]} : vector<8x128xf32> to vector<8x32xf32>
    %346 = vector.extract_strided_slice %344 {offsets = [0, 32], sizes = [8, 32], strides = [1, 1]} : vector<8x128xf32> to vector<8x32xf32>
    %347 = vector.extract_strided_slice %344 {offsets = [0, 64], sizes = [8, 32], strides = [1, 1]} : vector<8x128xf32> to vector<8x32xf32>
    %cst_126 = arith.constant 2.000000e+00 : f32
    %348 = vector.broadcast %cst_126 : f32 to vector<8x32xf32>
    %349 = arith.mulf %348, %347 : vector<8x32xf32>
    %cst_127 = arith.constant 1.000000e+00 : f32
    %350 = vector.broadcast %cst_127 : f32 to vector<8x32xf32>
    %351 = arith.subf %349, %350 : vector<8x32xf32>
    %352 = vector.extract_strided_slice %344 {offsets = [0, 96], sizes = [8, 32], strides = [1, 1]} : vector<8x128xf32> to vector<8x32xf32>
    %353 = arith.mulf %346, %331 : vector<8x32xf32>
    %354 = arith.mulf %345, %351 : vector<8x32xf32>
    %355 = arith.addf %353, %354 : vector<8x32xf32>
    %356 = math.tanh %355 : vector<8x32xf32>
    %357 = arith.mulf %352, %356 : vector<8x32xf32>
    %c5_i32_128 = arith.constant 5 : i32
    %c8_i32_129 = arith.constant 8 : i32
    %358 = arith.muli %c5_i32_128, %c8_i32_129 : i32
    %359 = tpu.assume_multiple %358, 8 : i32
    %360 = arith.index_cast %359 : i32 to index
    %c0_130 = arith.constant 0 : index
    %361 = vector.load %arg15[%360, %c0_130] : memref<64x128xf32, #tpu.memory_space<vmem>>, vector<8x128xf32>
    %cst_131 = arith.constant dense<0.000000e+00> : vector<8x128xf32>
    %362 = tpu.matmul %357, %227, %cst_131 {dimension_numbers = #tpu.dot_dimension_numbers<[1], [0], [0], [1], [0, 0, 1, 1], [], []>} : vector<8x32xf32>, vector<32x128xf32>, vector<8x128xf32> -> vector<8x128xf32>
    %363 = arith.addf %361, %362 : vector<8x128xf32>
    %364 = arith.negf %363 : vector<8x128xf32>
    %365 = math.exp %364 : vector<8x128xf32>
    %cst_132 = arith.constant 1.000000e+00 : f32
    %366 = vector.broadcast %cst_132 : f32 to vector<8x128xf32>
    %367 = arith.addf %366, %365 : vector<8x128xf32>
    %368 = arith.divf %366, %367 : vector<8x128xf32>
    %369 = vector.extract_strided_slice %368 {offsets = [0, 0], sizes = [8, 32], strides = [1, 1]} : vector<8x128xf32> to vector<8x32xf32>
    %370 = vector.extract_strided_slice %368 {offsets = [0, 32], sizes = [8, 32], strides = [1, 1]} : vector<8x128xf32> to vector<8x32xf32>
    %371 = vector.extract_strided_slice %368 {offsets = [0, 64], sizes = [8, 32], strides = [1, 1]} : vector<8x128xf32> to vector<8x32xf32>
    %cst_133 = arith.constant 2.000000e+00 : f32
    %372 = vector.broadcast %cst_133 : f32 to vector<8x32xf32>
    %373 = arith.mulf %372, %371 : vector<8x32xf32>
    %cst_134 = arith.constant 1.000000e+00 : f32
    %374 = vector.broadcast %cst_134 : f32 to vector<8x32xf32>
    %375 = arith.subf %373, %374 : vector<8x32xf32>
    %376 = vector.extract_strided_slice %368 {offsets = [0, 96], sizes = [8, 32], strides = [1, 1]} : vector<8x128xf32> to vector<8x32xf32>
    %377 = arith.mulf %370, %355 : vector<8x32xf32>
    %378 = arith.mulf %369, %375 : vector<8x32xf32>
    %379 = arith.addf %377, %378 : vector<8x32xf32>
    %380 = math.tanh %379 : vector<8x32xf32>
    %381 = arith.mulf %376, %380 : vector<8x32xf32>
    %c6_i32_135 = arith.constant 6 : i32
    %c8_i32_136 = arith.constant 8 : i32
    %382 = arith.muli %c6_i32_135, %c8_i32_136 : i32
    %383 = tpu.assume_multiple %382, 8 : i32
    %384 = arith.index_cast %383 : i32 to index
    %c0_137 = arith.constant 0 : index
    %385 = vector.load %arg15[%384, %c0_137] : memref<64x128xf32, #tpu.memory_space<vmem>>, vector<8x128xf32>
    %cst_138 = arith.constant dense<0.000000e+00> : vector<8x128xf32>
    %386 = tpu.matmul %381, %227, %cst_138 {dimension_numbers = #tpu.dot_dimension_numbers<[1], [0], [0], [1], [0, 0, 1, 1], [], []>} : vector<8x32xf32>, vector<32x128xf32>, vector<8x128xf32> -> vector<8x128xf32>
    %387 = arith.addf %385, %386 : vector<8x128xf32>
    %388 = arith.negf %387 : vector<8x128xf32>
    %389 = math.exp %388 : vector<8x128xf32>
    %cst_139 = arith.constant 1.000000e+00 : f32
    %390 = vector.broadcast %cst_139 : f32 to vector<8x128xf32>
    %391 = arith.addf %390, %389 : vector<8x128xf32>
    %392 = arith.divf %390, %391 : vector<8x128xf32>
    %393 = vector.extract_strided_slice %392 {offsets = [0, 0], sizes = [8, 32], strides = [1, 1]} : vector<8x128xf32> to vector<8x32xf32>
    %394 = vector.extract_strided_slice %392 {offsets = [0, 32], sizes = [8, 32], strides = [1, 1]} : vector<8x128xf32> to vector<8x32xf32>
    %395 = vector.extract_strided_slice %392 {offsets = [0, 64], sizes = [8, 32], strides = [1, 1]} : vector<8x128xf32> to vector<8x32xf32>
    %cst_140 = arith.constant 2.000000e+00 : f32
    %396 = vector.broadcast %cst_140 : f32 to vector<8x32xf32>
    %397 = arith.mulf %396, %395 : vector<8x32xf32>
    %cst_141 = arith.constant 1.000000e+00 : f32
    %398 = vector.broadcast %cst_141 : f32 to vector<8x32xf32>
    %399 = arith.subf %397, %398 : vector<8x32xf32>
    %400 = vector.extract_strided_slice %392 {offsets = [0, 96], sizes = [8, 32], strides = [1, 1]} : vector<8x128xf32> to vector<8x32xf32>
    %401 = arith.mulf %394, %379 : vector<8x32xf32>
    %402 = arith.mulf %393, %399 : vector<8x32xf32>
    %403 = arith.addf %401, %402 : vector<8x32xf32>
    %404 = math.tanh %403 : vector<8x32xf32>
    %405 = arith.mulf %400, %404 : vector<8x32xf32>
    %c7_i32_142 = arith.constant 7 : i32
    %c8_i32_143 = arith.constant 8 : i32
    %406 = arith.muli %c7_i32_142, %c8_i32_143 : i32
    %407 = tpu.assume_multiple %406, 8 : i32
    %408 = arith.index_cast %407 : i32 to index
    %c0_144 = arith.constant 0 : index
    %409 = vector.load %arg15[%408, %c0_144] : memref<64x128xf32, #tpu.memory_space<vmem>>, vector<8x128xf32>
    %cst_145 = arith.constant dense<0.000000e+00> : vector<8x128xf32>
    %410 = tpu.matmul %405, %227, %cst_145 {dimension_numbers = #tpu.dot_dimension_numbers<[1], [0], [0], [1], [0, 0, 1, 1], [], []>} : vector<8x32xf32>, vector<32x128xf32>, vector<8x128xf32> -> vector<8x128xf32>
    %411 = arith.addf %409, %410 : vector<8x128xf32>
    %412 = arith.negf %411 : vector<8x128xf32>
    %413 = math.exp %412 : vector<8x128xf32>
    %cst_146 = arith.constant 1.000000e+00 : f32
    %414 = vector.broadcast %cst_146 : f32 to vector<8x128xf32>
    %415 = arith.addf %414, %413 : vector<8x128xf32>
    %416 = arith.divf %414, %415 : vector<8x128xf32>
    %417 = vector.extract_strided_slice %416 {offsets = [0, 0], sizes = [8, 32], strides = [1, 1]} : vector<8x128xf32> to vector<8x32xf32>
    %418 = vector.extract_strided_slice %416 {offsets = [0, 32], sizes = [8, 32], strides = [1, 1]} : vector<8x128xf32> to vector<8x32xf32>
    %419 = vector.extract_strided_slice %416 {offsets = [0, 64], sizes = [8, 32], strides = [1, 1]} : vector<8x128xf32> to vector<8x32xf32>
    %cst_147 = arith.constant 2.000000e+00 : f32
    %420 = vector.broadcast %cst_147 : f32 to vector<8x32xf32>
    %421 = arith.mulf %420, %419 : vector<8x32xf32>
    %cst_148 = arith.constant 1.000000e+00 : f32
    %422 = vector.broadcast %cst_148 : f32 to vector<8x32xf32>
    %423 = arith.subf %421, %422 : vector<8x32xf32>
    %424 = vector.extract_strided_slice %416 {offsets = [0, 96], sizes = [8, 32], strides = [1, 1]} : vector<8x128xf32> to vector<8x32xf32>
    %425 = arith.mulf %418, %403 : vector<8x32xf32>
    %426 = arith.mulf %417, %423 : vector<8x32xf32>
    %427 = arith.addf %425, %426 : vector<8x32xf32>
    %428 = math.tanh %427 : vector<8x32xf32>
    %429 = arith.mulf %424, %428 : vector<8x32xf32>
    %c8_i32_149 = arith.constant 8 : i32
    %c1_150 = arith.constant 1 : index
    %c0_151 = arith.constant 0 : index
    %c0_152 = arith.constant 0 : index
    %430 = vector.load %arg11[%c1_150, %c0_151, %c0_152] : memref<2x8x32xf32, #tpu.memory_space<vmem>>, vector<1x8x32xf32>
    %431 = vector.shape_cast %430 : vector<1x8x32xf32> to vector<8x32xf32>
    %432 = vector.shape_cast %429 : vector<8x32xf32> to vector<1x8x32xf32>
    tpu.vector_store %arg11[%c1_150, %c0_151, %c0_152], %432 {strides = array<i32>} : memref<2x8x32xf32, #tpu.memory_space<vmem>>, vector<1x8x32xf32>,
    %c1_153 = arith.constant 1 : index
    %c0_154 = arith.constant 0 : index
    %c0_155 = arith.constant 0 : index
    %433 = vector.load %arg12[%c1_153, %c0_154, %c0_155] : memref<2x8x32xf32, #tpu.memory_space<vmem>>, vector<1x8x32xf32>
    %434 = vector.shape_cast %433 : vector<1x8x32xf32> to vector<8x32xf32>
    %435 = vector.shape_cast %427 : vector<8x32xf32> to vector<1x8x32xf32>
    tpu.vector_store %arg12[%c1_153, %c0_154, %c0_155], %435 {strides = array<i32>} : memref<2x8x32xf32, #tpu.memory_space<vmem>>, vector<1x8x32xf32>,
    %c0_156 = arith.constant 0 : index
    %c0_157 = arith.constant 0 : index
    %436 = vector.load %arg9[%c0_156, %c0_157] : memref<1x32xf32, #tpu.memory_space<vmem>>, vector<1x32xf32>
    %437 = vector.broadcast %436 : vector<1x32xf32> to vector<8x32xf32>
    %438 = arith.mulf %429, %437 : vector<8x32xf32>
    %cst_158 = arith.constant dense<0.000000e+00> : vector<8xf32>
    %439 = vector.multi_reduction <add>, %438, %cst_158 [1] : vector<8x32xf32> to vector<8xf32>
    %440 = vector.shape_cast %439 : vector<8xf32> to vector<8x1xf32>
    %c0_159 = arith.constant 0 : index
    %c0_160 = arith.constant 0 : index
    %441 = vector.load %arg10[%c0_159, %c0_160] : memref<1x1xf32, #tpu.memory_space<vmem>>, vector<1x1xf32>
    %442 = vector.broadcast %441 : vector<1x1xf32> to vector<8x1xf32>
    %443 = arith.addf %440, %442 : vector<8x1xf32>
    %444 = arith.negf %443 : vector<8x1xf32>
    %445 = math.exp %444 : vector<8x1xf32>
    %cst_161 = arith.constant 1.000000e+00 : f32
    %446 = vector.broadcast %cst_161 : f32 to vector<8x1xf32>
    %447 = arith.addf %446, %445 : vector<8x1xf32>
    %448 = arith.divf %446, %447 : vector<8x1xf32>
    %c0_162 = arith.constant 0 : index
    %c0_163 = arith.constant 0 : index
    %449 = vector.load %arg13[%c0_162, %c0_163] : memref<8x1xf32, #tpu.memory_space<vmem>>, vector<8x1xf32>
    tpu.vector_store %arg13[%c0_162, %c0_163], %448 {strides = array<i32>} : memref<8x1xf32, #tpu.memory_space<vmem>>, vector<8x1xf32>,
    return
  }
}

</mosaic_0001>

<bundles_post_ra>
// kernel: sentimental_analysis_forward.1
= control target key start
LH: loop header
LB: loop body
LE: loop exit
PB: predicated region body
PF: predicated region fallthrough
CT: control target
= control target key end

     0   :  { %s3775_s0 = inlined_call_operand.hbm [shape: f32[64,16], index: 0, kind: input, shape index: {}]   ;;  %s3776_s1 = inlined_call_operand.hbm [shape: f32[2,8,32], index: 1, kind: input, shape index: {}]   ;;  %s3777_s2 = inlined_call_operand.hbm [shape: f32[2,8,32], index: 2, kind: input, shape index: {}]   ;;  %s3778_s3 = inlined_call_operand.hbm [shape: f32[16,128], index: 3, kind: input, shape index: {}]   ;;  %s3779_s4 = inlined_call_operand.hbm [shape: f32[32,128], index: 4, kind: input, shape index: {}]   ;;  %s3780_s5 = inlined_call_operand.hbm [shape: f32[1,128], index: 5, kind: input, shape index: {}]   ;;  %s3781_s6 = inlined_call_operand.hbm [shape: f32[32,128], index: 6, kind: input, shape index: {}]   ;;  %s3782_s7 = inlined_call_operand.hbm [shape: f32[32,128], index: 7, kind: input, shape index: {}]   ;;  %s3783_s8 = inlined_call_operand.hbm [shape: f32[1,128], index: 8, kind: input, shape index: {}]   ;;  %s3784_s9 = inlined_call_operand.hbm [shape: f32[1,32], index: 9, kind: input, shape index: {}]   ;;  %s3785_s10 = inlined_call_operand.<no memory space> [shape: f32[1,1], index: 10, kind: input, shape index: {}]   ;;  %s3786_s11 = inlined_call_operand.hbm [shape: f32[2,8,32], index: 11, kind: output, shape index: {0}]   ;;  %s3787_s12 = inlined_call_operand.hbm [shape: f32[2,8,32], index: 12, kind: output, shape index: {1}]   ;;  %s3788_s13 = inlined_call_operand.hbm [shape: f32[8,1], index: 13, kind: output, shape index: {2}]  }
   0x1   :  { %v19_v0 = vstv %s3785_s10 }
   0x2   :  { %20 = vst [vmem:[#allocation4] sm:$0x1] %v19_v0 }
   0x3   :  { %21 = vsyncpa [#allocation6], 0 }
   0x4   :  { %22 = vsyncpa [#allocation9], 0 }
   0x5   :  { %23 = vsyncpa [#allocation12], 0 }
   0x6   :  { %24 = vsyncpa [#allocation15], 0 }
   0x7   :  { %25 = vsyncpa [#allocation18], 0 }
   0x8   :  { %26 = vsyncpa [#allocation21], 0 }
   0x9   :  { %27 = vsyncpa [#allocation7], 0 }
   0xa   :  { %28 = vsyncpa [#allocation24], 0  ;;  %s3186_s27 = smov [#allocation8]   ;;  %s3187_s29 = smov [#allocation11]  }
   0xb   :  { %s46_s28 = sshll.u32 %s3186_s27, 4  ;;  %s70_s30 = sshll.u32 %s3187_s29, 4  ;;  %s47_s28 = int_to_ptr.vmem [resolvable:$true] %s46_s28  ;;  %s3280_s30 = int_to_ptr.vmem [resolvable:$true] %s70_s30 }
   0xc   :  { %s2884_s10 = scalar_lea.hbm %s3776_s1, 256 }
   0xd   :  { %p2885_p0 = scmp.ne.s32.totalorder %s3776_s1, %s2884_s10  ;;  %p2888_p1 = scmp.lt.u32.totalorder %s2884_s10, %s3776_s1 }
   0xf   :  { %p2890_p2 = pnand %p2888_p1, %p2885_p0 }
  0x11   :  { %2893 = shalt.err (!%p2890_p2)
}
  0x12   :  { %s2894_s20 = scalar_lea.vmem %s47_s28, 256  ;;  %p2899_p4 = scmp.lt.s32.totalorder %s47_s28, %s47_s28 }
  0x13   :  { %p2895_p3 = scmp.ne.s32.totalorder %s47_s28, %s2894_s20  ;;  %p2900_p5 = scmp.lt.s32.totalorder %s2894_s20, %s2894_s20 }
  0x15   :  { %p2901_p6 = por %p2900_p5, %p2899_p4 }
  0x17   :  { %p2902_p7 = pnand %p2901_p6, %p2895_p3 }
  0x19   :  { %2905 = shalt.err (!%p2902_p7)
}
  0x1a   :  { %s3188_s21 = smov 128   ;;  %s3189_s22 = smov 8  }
  0x1b   :  { %52 = dma.hbm_to_vmem [thread:$0]  %s3776_s1, 256, %s47_s28, [#allocation9], %s3188_s21, %s3188_s21, %s3189_s22  }
  0x1c   :  { %s2906_s27 = scalar_lea.hbm %s3778_s3, 256 }
  0x1d   :  { %p2907_p8 = scmp.ne.s32.totalorder %s3778_s3, %s2906_s27  ;;  %p2910_p9 = scmp.lt.u32.totalorder %s2906_s27, %s3778_s3 }
  0x1f   :  { %p2912_p10 = pnand %p2910_p9, %p2907_p8 }
  0x21   :  { %2915 = shalt.err (!%p2912_p10)
}
  0x22   :  { %s2916_s16 = scalar_lea.vmem %s3280_s30, 256  ;;  %p2921_p12 = scmp.lt.s32.totalorder %s3280_s30, %s3280_s30 }
  0x23   :  { %p2917_p11 = scmp.ne.s32.totalorder %s3280_s30, %s2916_s16  ;;  %p2922_p13 = scmp.lt.s32.totalorder %s2916_s16, %s2916_s16 }
  0x25   :  { %p2923_p0 = por %p2922_p13, %p2921_p12 }
  0x27   :  { %p2924_p1 = pnand %p2923_p0, %p2917_p11 }
  0x29   :  { %2927 = shalt.err (!%p2924_p1)
}
  0x2a   :  { %76 = dma.hbm_to_vmem [thread:$0]  %s3778_s3, 256, %s3280_s30, [#allocation12], %s3188_s21, %s3188_s21, %s3189_s22  }
  0x2b   :  { %s3190_s17 = smov [#allocation14]   ;;  %s3191_s19 = smov [#allocation17]  }
  0x2c   :  { %s95_s18 = sshll.u32 %s3190_s17, 4  ;;  %s116_s20 = sshll.u32 %s3191_s19, 4  ;;  %s96_s18 = int_to_ptr.vmem [resolvable:$true] %s95_s18  ;;  %s3317_s20 = int_to_ptr.vmem [resolvable:$true] %s116_s20 }
  0x2d   :  { %s2928_s25 = scalar_lea.hbm %s3780_s5, 16 }
  0x2e   :  { %p2929_p2 = scmp.ne.s32.totalorder %s3780_s5, %s2928_s25  ;;  %p2932_p3 = scmp.lt.u32.totalorder %s2928_s25, %s3780_s5 }
  0x30   :  { %p2934_p4 = pnand %p2932_p3, %p2929_p2 }
  0x32   :  { %2937 = shalt.err (!%p2934_p4)
}
  0x33   :  { %s2938_s3 = scalar_lea.vmem %s96_s18, 16  ;;  %s2942_s30 = scalar_lea.vmem %s96_s18, 32 }
  0x34   :  { %p2939_p5 = scmp.ne.s32.totalorder %s96_s18, %s2938_s3  ;;  %p2943_p6 = scmp.lt.s32.totalorder %s96_s18, %s96_s18 }
  0x35   :  { %p2944_p7 = scmp.lt.s32.totalorder %s2942_s30, %s2938_s3 }
  0x37   :  { %p2945_p8 = por %p2944_p7, %p2943_p6 }
  0x39   :  { %p2946_p9 = pnand %p2945_p8, %p2939_p5 }
  0x3b   :  { %2949 = shalt.err (!%p2946_p9)
}
  0x3c   :  { %98 = dma.hbm_to_vmem [thread:$0]  %s3780_s5, 16, %s96_s18, [#allocation15]  }
  0x3d   :  { %s2950_s28 = scalar_lea.hbm %s3782_s7, 512 }
  0x3e   :  { %p2951_p10 = scmp.ne.s32.totalorder %s3782_s7, %s2950_s28  ;;  %p2954_p11 = scmp.lt.u32.totalorder %s2950_s28, %s3782_s7 }
  0x40   :  { %p2956_p12 = pnand %p2954_p11, %p2951_p10 }
  0x42   :  { %2959 = shalt.err (!%p2956_p12)
}
  0x43   :  { %s2960_s25 = scalar_lea.vmem %s3317_s20, 512  ;;  %p2965_p0 = scmp.lt.s32.totalorder %s3317_s20, %s3317_s20 }
  0x44   :  { %p2961_p13 = scmp.ne.s32.totalorder %s3317_s20, %s2960_s25  ;;  %p2966_p1 = scmp.lt.s32.totalorder %s2960_s25, %s2960_s25 }
  0x46   :  { %p2967_p2 = por %p2966_p1, %p2965_p0 }
  0x48   :  { %p2968_p3 = pnand %p2967_p2, %p2961_p13 }
  0x4a   :  { %2971 = shalt.err (!%p2968_p3)
}
  0x4b   :  { %122 = dma.hbm_to_vmem [thread:$0]  %s3782_s7, 512, %s3317_s20, [#allocation18], %s3188_s21, %s3188_s21, %s3189_s22  }
  0x4c   :  { %s3192_s26 = smov [#allocation5]   ;;  %s3193_s29 = smov [#allocation10]  }
  0x4d   :  { %s34_s27 = sshll.u32 %s3192_s26, 4  ;;  %s58_s14 = sshll.u32 %s3193_s29, 4  ;;  %s35_s27 = int_to_ptr.vmem [resolvable:$true] %s34_s27  ;;  %s3351_s14 = int_to_ptr.vmem [resolvable:$true] %s58_s14 }
  0x4e   :  { %s2972_s15 = scalar_lea.hbm %s3775_s0, 1024 }
  0x4f   :  { %p2973_p4 = scmp.ne.s32.totalorder %s3775_s0, %s2972_s15  ;;  %p2976_p5 = scmp.lt.u32.totalorder %s2972_s15, %s3775_s0 }
  0x51   :  { %p2978_p6 = pnand %p2976_p5, %p2973_p4 }
  0x53   :  { %2981 = shalt.err (!%p2978_p6)
}
  0x54   :  { %s2982_s7 = scalar_lea.vmem %s35_s27, 1024  ;;  %p2987_p8 = scmp.lt.s32.totalorder %s35_s27, %s35_s27 }
  0x55   :  { %p2983_p7 = scmp.ne.s32.totalorder %s35_s27, %s2982_s7  ;;  %p2988_p9 = scmp.lt.s32.totalorder %s2982_s7, %s2982_s7 }
  0x57   :  { %p2989_p10 = por %p2988_p9, %p2987_p8 }
  0x59   :  { %p2990_p11 = pnand %p2989_p10, %p2983_p7 }
  0x5b   :  { %2993 = shalt.err (!%p2990_p11)
}
  0x5c   :  { %40 = dma.hbm_to_vmem [thread:$0]  %s3775_s0, 1024, %s35_s27, [#allocation6], %s3188_s21, %s3188_s21, %s3189_s22  }
  0x5d   :  { %s2994_s24 = scalar_lea.hbm %s3777_s2, 256 }
  0x5e   :  { %p2995_p12 = scmp.ne.s32.totalorder %s3777_s2, %s2994_s24  ;;  %p2998_p13 = scmp.lt.u32.totalorder %s2994_s24, %s3777_s2 }
  0x60   :  { %p3000_p0 = pnand %p2998_p13, %p2995_p12 }
  0x62   :  { %3003 = shalt.err (!%p3000_p0)
}
  0x63   :  { %s3004_s29 = scalar_lea.vmem %s3351_s14, 256  ;;  %p3009_p2 = scmp.lt.s32.totalorder %s3351_s14, %s3351_s14 }
  0x64   :  { %p3005_p1 = scmp.ne.s32.totalorder %s3351_s14, %s3004_s29  ;;  %p3010_p3 = scmp.lt.s32.totalorder %s3004_s29, %s3004_s29 }
  0x66   :  { %p3011_p4 = por %p3010_p3, %p3009_p2 }
  0x68   :  { %p3012_p5 = pnand %p3011_p4, %p3005_p1 }
  0x6a   :  { %3015 = shalt.err (!%p3012_p5)
}
  0x6b   :  { %64 = dma.hbm_to_vmem [thread:$0]  %s3777_s2, 256, %s3351_s14, [#allocation9], %s3188_s21, %s3188_s21, %s3189_s22  }
  0x6c   :  { %s3194_s3 = smov [#allocation13]   ;;  %s3195_s15 = smov [#allocation16]  }
  0x6d   :  { %s82_s30 = sshll.u32 %s3194_s3, 4  ;;  %s104_s10 = sshll.u32 %s3195_s15, 4  ;;  %s83_s30 = int_to_ptr.vmem [resolvable:$true] %s82_s30  ;;  %s3388_s10 = int_to_ptr.vmem [resolvable:$true] %s104_s10 }
  0x6e   :  { %s3016_s28 = scalar_lea.hbm %s3779_s4, 512 }
  0x6f   :  { %p3017_p6 = scmp.ne.s32.totalorder %s3779_s4, %s3016_s28  ;;  %p3020_p7 = scmp.lt.u32.totalorder %s3016_s28, %s3779_s4 }
  0x71   :  { %p3022_p8 = pnand %p3020_p7, %p3017_p6 }
  0x73   :  { %3025 = shalt.err (!%p3022_p8)
}
  0x74   :  { %s3026_s2 = scalar_lea.vmem %s83_s30, 512  ;;  %p3031_p10 = scmp.lt.s32.totalorder %s83_s30, %s83_s30 }
  0x75   :  { %p3027_p9 = scmp.ne.s32.totalorder %s83_s30, %s3026_s2  ;;  %p3032_p11 = scmp.lt.s32.totalorder %s3026_s2, %s3026_s2 }
  0x77   :  { %p3033_p12 = por %p3032_p11, %p3031_p10 }
  0x79   :  { %p3034_p13 = pnand %p3033_p12, %p3027_p9 }
  0x7b   :  { %3037 = shalt.err (!%p3034_p13)
}
  0x7c   :  { %88 = dma.hbm_to_vmem [thread:$0]  %s3779_s4, 512, %s83_s30, [#allocation12], %s3188_s21, %s3188_s21, %s3189_s22  }
  0x7d   :  { %s3038_s5 = scalar_lea.hbm %s3781_s6, 512 }
  0x7e   :  { %p3039_p0 = scmp.ne.s32.totalorder %s3781_s6, %s3038_s5  ;;  %p3042_p1 = scmp.lt.u32.totalorder %s3038_s5, %s3781_s6 }
  0x80   :  { %p3044_p2 = pnand %p3042_p1, %p3039_p0 }
  0x82   :  { %3047 = shalt.err (!%p3044_p2)
}
  0x83   :  { %s3048_s27 = scalar_lea.vmem %s3388_s10, 512  ;;  %p3053_p4 = scmp.lt.s32.totalorder %s3388_s10, %s3388_s10 }
  0x84   :  { %p3049_p3 = scmp.ne.s32.totalorder %s3388_s10, %s3048_s27  ;;  %p3054_p5 = scmp.lt.s32.totalorder %s3048_s27, %s3048_s27 }
  0x86   :  { %p3055_p6 = por %p3054_p5, %p3053_p4 }
  0x88   :  { %p3056_p7 = pnand %p3055_p6, %p3049_p3 }
  0x8a   :  { %3059 = shalt.err (!%p3056_p7)
}
  0x8b   :  { %110 = dma.hbm_to_vmem [thread:$0]  %s3781_s6, 512, %s3388_s10, [#allocation15], %s3188_s21, %s3188_s21, %s3189_s22  }
  0x8c   :  { %s3196_s30 = smov [#allocation19]   ;;  %s3197_s16 = smov [#allocation20]  }
  0x8d   :  { %s129_s15 = sshll.u32 %s3196_s30, 4  ;;  %s139_s1 = sshll.u32 %s3197_s16, 4  ;;  %s130_s15 = int_to_ptr.vmem [resolvable:$true] %s129_s15  ;;  %s140_s1 = int_to_ptr.vmem [resolvable:$true] %s139_s1 }
  0x8e   :  { %s3060_s20 = scalar_lea.hbm %s3783_s8, 16 }
  0x8f   :  { %p3061_p8 = scmp.ne.s32.totalorder %s3783_s8, %s3060_s20  ;;  %p3064_p9 = scmp.lt.u32.totalorder %s3060_s20, %s3783_s8 }
  0x91   :  { %p3066_p10 = pnand %p3064_p9, %p3061_p8 }
  0x93   :  { %3069 = shalt.err (!%p3066_p10)
}
  0x94   :  { %s3070_s6 = scalar_lea.vmem %s130_s15, 16  ;;  %s3074_s10 = scalar_lea.vmem %s130_s15, 32 }
  0x95   :  { %p3071_p11 = scmp.ne.s32.totalorder %s130_s15, %s3070_s6  ;;  %p3075_p12 = scmp.lt.s32.totalorder %s130_s15, %s130_s15 }
  0x96   :  { %p3076_p13 = scmp.lt.s32.totalorder %s3074_s10, %s3070_s6 }
  0x98   :  { %p3077_p0 = por %p3076_p13, %p3075_p12 }
  0x9a   :  { %p3078_p1 = pnand %p3077_p0, %p3071_p11 }
  0x9c   :  { %3081 = shalt.err (!%p3078_p1)
}
  0x9d   :  { %132 = dma.hbm_to_vmem [thread:$0]  %s3783_s8, 16, %s130_s15, [#allocation18]  }
  0x9e   :  { %s3082_s18 = scalar_lea.hbm %s3784_s9, 16 }
  0x9f   :  { %p3083_p2 = scmp.ne.s32.totalorder %s3784_s9, %s3082_s18  ;;  %p3086_p3 = scmp.lt.u32.totalorder %s3082_s18, %s3784_s9 }
  0xa1   :  { %p3088_p4 = pnand %p3086_p3, %p3083_p2 }
  0xa3   :  { %3091 = shalt.err (!%p3088_p4)
}
  0xa4   :  { %s3092_s4 = scalar_lea.vmem %s140_s1, 16  ;;  %s3096_s3 = scalar_lea.vmem %s140_s1, 32 }
  0xa5   :  { %p3093_p5 = scmp.ne.s32.totalorder %s140_s1, %s3092_s4  ;;  %p3097_p6 = scmp.lt.s32.totalorder %s140_s1, %s140_s1 }
  0xa6   :  { %p3098_p7 = scmp.lt.s32.totalorder %s3096_s3, %s3092_s4 }
  0xa8   :  { %p3099_p8 = por %p3098_p7, %p3097_p6 }
  0xaa   :  { %p3100_p9 = pnand %p3099_p8, %p3093_p5 }
  0xac   :  { %3103 = shalt.err (!%p3100_p9)
}
  0xad   :  { %142 = dma.hbm_to_vmem [thread:$0]  %s3784_s9, 16, %s140_s1, [#allocation21]  }
  0xae   :  { %3170 = dma.done.wait [#allocation6], 1024  }
  0xaf   :  { %3171 = vsyncadd [#allocation6], 4294966272 }
  0xb0   :  { %3172 = dma.done.wait [#allocation9], 512  }
  0xb1   :  { %3173 = vsyncadd [#allocation9], 4294966784 }
  0xb2   :  { %3174 = dma.done.wait [#allocation12], 768  }
  0xb3   :  { %3175 = vsyncadd [#allocation12], 4294966528 }
  0xb4   :  { %3176 = dma.done.wait [#allocation15], 528  }
  0xb5   :  { %3177 = vsyncadd [#allocation15], 4294966768 }
  0xb6   :  { %3178 = dma.done.wait [#allocation18], 528  }
  0xb7   :  { %3179 = vsyncadd [#allocation18], 4294966768 }
  0xb8   :  { %3180 = dma.done.wait [#allocation21], 16  }
  0xb9   :  { %3181 = vsyncadd [#allocation21], 4294967280  ;;  %v3198_v1 = vmov 0.0|0.0   ;;  %vm3199_vm0 = vmmov 0   ;;  %v3200_v2 = vmov 0.0   ;;  %vm196_vm1 = vcmask 130048  }
  0xba   :  { %2659 = vmatprep.subr.bf16.mxu1 %v3198_v1  ;;  %2467 = vmatprep.mubr.msk.f32.mxu1 %vm3199_vm0, %v3200_v2  ;;  %v175_v3 = vld [vmem:[#allocation11] sm:$0xff]  ;;  %v176_v4 = vld [vmem:[#allocation11 + $0x8] sm:$0xff]  ;;  %v177_v5 = vld [vmem:[#allocation13] sm:$0xff]  ;;  %vm337_vm2 = vcmask 261120   ;;  %s3201_s9 = smov 64   ;;  %s3202_s15 = smov 32  }
  0xbb   :  { %v2655_v6 = vpack.c.bf16 %v176_v4, %v175_v3  ;;  %v178_v7 = vld [vmem:[#allocation13 + $0x8] sm:$0xff]  ;;  %v182_v8 = vld [vmem:[#allocation5] sm:$0xff]  ;;  %v180_v11 = vld [vmem:[#allocation13 + $0x18] sm:$0xff]  ;;  %s3203_s16 = smov 96   ;;  %s3204_s1 = smov [#allocation23]  }
  0xbc   :  { %v3452_v9 = vpack.c.bf16 %v178_v7, %v177_v5  ;;  %2447 = vmatprep.mubr.msk.f32.mxu0 %vm196_vm1, %v182_v8  ;;  %v179_v10 = vld [vmem:[#allocation13 + $0x10] sm:$0xff]  ;;  %v183_v12 = vld [vmem:[#allocation5 + $0x8] sm:$0xff]  ;;  %v3474_v15 = vld [vmem:[#allocation14] ss:$0 sm:$0xff]  ;;  %s2238_s28 = sshll.u32 %s3204_s1, 4  ;;  %s3205_s7 = smov [#allocation22]   ;;  %s2239_s28 = int_to_ptr.vmem [resolvable:$true] %s2238_s28 }
  0xbd   :  { %2656 = vmatprep.subr.bf16.mxu0 %v2655_v6  ;;  %v3456_v13 = vpack.c.bf16 %v180_v11, %v179_v10  ;;  %v334_v14 = vld [vmem:[#allocation8] sm:$0xff]  ;;  %v335_v28 = vld [vmem:[#allocation10] sm:$0xff]  ;;  %v185_v55 = vld [vmem:[#allocation5 + $0x18] sm:$0xff]  ;;  %s2226_s20 = sshll.u32 %s3205_s7, 4  ;;  %s3104_s17 = scalar_lea.vmem %s2239_s28, 256  ;;  %s3726_s20 = int_to_ptr.vmem [resolvable:$true] %s2226_s20 }
  0xbe   :  { %2661 = vmatpush3.bf16.msra.mxu1 %v3452_v9  ;;  %2658 = vmatpush3.bf16.msra.mxu0 %v2655_v6  ;;  %v184_v54 = vld [vmem:[#allocation5 + $0x10] sm:$0xff]  ;;  %v186_v56 = vld [vmem:[#allocation5 + $0x20] sm:$0xff]  ;;  %v187_v57 = vld [vmem:[#allocation5 + $0x28] sm:$0xff]  ;;  %p3105_p10 = scmp.ne.s32.totalorder %s2239_s28, %s3104_s17  ;;  %p3109_p11 = scmp.lt.s32.totalorder %s2239_s28, %s2239_s28 }
  0xbf   :  { %2662 = vmatprep.subr.bf16.mxu1 %v3198_v1  ;;  %2671 = vmatprep.subr.bf16.mxu0 %v3198_v1  ;;  %v188_v58 = vld [vmem:[#allocation5 + $0x30] sm:$0xff]  ;;  %v189_v59 = vld [vmem:[#allocation5 + $0x38] sm:$0xff]  ;;  %p3110_p12 = scmp.lt.s32.totalorder %s3104_s17, %s3104_s17 }
  0xc1   :  { %2448 = vmatmul.mubr.msk.f32.vlgmr.msra.gmra.mrb[0].mxu0 %vm196_vm1, %v183_v12  ;;  %p3111_p13 = por %p3110_p12, %p3109_p11 }
  0xc2   :  { %2664 = vmatpush3.bf16.msra.mxu1 %v3456_v13  ;;  %2673 = vmatpush3.bf16.msra.mxu0 %v3452_v9 }
  0xc3   :  { %2665 = vmatprep.subr.bf16.mxu1 %v3198_v1  ;;  %2674 = vmatprep.subr.bf16.mxu0 %v3198_v1  ;;  %p3112_p0 = pnand %p3111_p13, %p3105_p10 }
  0xc4   :  { %2450 = vmatprep.mubr.msk.f32.mxu0 %vm196_vm1, %v184_v54 }
  0xc5   :  { %2468 = vmatmul.mubr.msk.f32.vlgmr.msra.gmra.mrb[0].mxu1 %vm337_vm2, %v334_v14  ;;  %2451 = vmatmul.mubr.msk.f32.gmra.mrb[2].mxu0 %vm196_vm1, %v185_v55 }
  0xc6   :  { %2667 = vmatpush3.bf16.msra.mxu1 %v3452_v9  ;;  %2478 = vmatprep.mubr.msk.f32.mxu1 %vm3199_vm0, %v3200_v2 }
  0xc7   :  { %2668 = vmatprep.subr.bf16.mxu1 %v3198_v1  ;;  %2676 = vmatpush3.bf16.msra.mxu0 %v3456_v13 }
  0xc8   :  { %2683 = vmatprep.subr.bf16.mxu0 %v3198_v1  ;;  %2453 = vmatprep.mubr.msk.f32.mxu0 %vm196_vm1, %v186_v56 }
  0xc9   :  { %2454 = vmatmul.mubr.msk.f32.gmra.mrb[4].mxu0 %vm196_vm1, %v187_v57 }
  0xca   :  { %2670 = vmatpush3.bf16.msra.mxu1 %v3456_v13  ;;  %2456 = vmatprep.mubr.msk.f32.mxu0 %vm196_vm1, %v188_v58 }
  0xcb   :  { %2677 = vmatprep.subr.bf16.mxu1 %v3198_v1 }
  0xcd   :  { %2457 = vmatmul.mubr.msk.f32.gmra.mrb[6].mxu0 %vm196_vm1, %v189_v59 }
  0xce   :  { %2489 = vmatprep.mubr.msk.f32.mxu0 %vm3199_vm0, %v3200_v2 }
 0x194   :  { %v2449_v16 = vpop.f32.mrb[0].mxu0 }
 0x195   :  { %v287_v17 = vpop.f32.mrb[1].mxu0  ;;  %v293_v39 = vadd.f32 %v2449_v16, %v3474_v15 }
 0x196   :  { %v288_v18 = vadd.f32 %v3474_v15, %v287_v17 }
 0x198   :  { %v407_v19 = vpop.f32.mrb[0].mxu1  ;;  %v2452_v63 = vpop.f32.mrb[2].mxu0 }
 0x199   :  { %v411_v20 = vadd.f32 %v407_v19, %v288_v18  ;;  %v2469_v21 = vpop.f32.mrb[1].mxu1  ;;  %v297_v0 = vpop.f32.mrb[3].mxu0 }
 0x19a   :  { %v298_v8 = vadd.f32 %v3474_v15, %v297_v0 }
 0x19b   :  { %v2282_v22 = vmul.f32 -1.442695, %v411_v20 }
 0x19c   :  { %v3503_v3 = vpop.f32.mrb[4].mxu0 }
 0x19d   :  { %2784 = vpow2.f32 %v2282_v22  ;;  %v3505_v4 = vpop.f32.mrb[5].mxu0 }
 0x1a0   :  { %v3507_v5 = vpop.f32.mrb[6].mxu0 }
 0x1a1   :  { %v3509_v6 = vpop.f32.mrb[7].mxu0 }
 0x1a7   :  { %v2785_v23 = vpop.eup %2784 }
 0x1a8   :  { %v415_v24 = vadd.f32 1.0, %v2785_v23 }
 0x1aa   :  { %2786 = vrcp.f32 %v415_v24 }
 0x1b4   :  { %v2787_v25 = vpop.eup %2786 }
 0x1b5   :  { %v418_v26 = vmul.f32 2.0, %v2787_v25 }
 0x1b7   :  { %v2283_v27 = vadd.f32 -1.0, %v418_v26 }
 0x1b9   :  { %426 = vrot.lane.b32.xlu0 %v2283_v27, %s3201_s9 }
 0x1bd   :  { %421 = vrot.lane.b32.xlu0 %v335_v28, %s3202_s15 }
 0x22b   :  { %v427_v29 = vpop.permute.xlu0 %426 }
 0x22c   :  { %v429_v30 = vmul.f32 %v2787_v25, %v427_v29 }
 0x22e   :  { %431 = vrot.lane.b32.xlu1 %v429_v30, %s3202_s15  ;;  %v303_v30 = vadd.f32 %v2452_v63, %v3474_v15 }
 0x22f   :  { %v422_v31 = vpop.permute.xlu0 %421 }
 0x230   :  { %v424_v32 = vmul.f32 %v2787_v25, %v422_v31 }
 0x2a0   :  { %v432_v33 = vpop.permute.xlu1 %431 }
 0x2a1   :  { %v434_v34 = vadd.f32 %v432_v33, %v424_v32 }
 0x2a3   :  { %2788 = vtanh.f32 %v434_v34 }
 0x2ad   :  { %v2789_v35 = vpop.eup %2788 }
 0x2ae   :  { %437 = vrot.lane.b32.xlu1 %v2789_v35, %s3201_s9 }
 0x320   :  { %v438_v36 = vpop.permute.xlu1 %437 }
 0x321   :  { %v440_v37 = vmul.f32 %v2787_v25, %v438_v36 }
 0x323   :  { %442 = vrot.lane.b32.xlu0 %v440_v37, %s3202_s15 }
 0x395   :  { %v443_v38 = vpop.permute.xlu0 %442 }
 0x396   :  { %445 = vst.msk [vmem:[#allocation2] sm:$0xff] %vm337_vm2, %v443_v38  ;;  %2479 = vmatmul.mubr.msk.f32.vlgmr.msra.gmra.mrb[2].mxu1 %vm337_vm2, %v443_v38 }
 0x397   :  { %2679 = vmatpush3.bf16.msra.mxu1 %v3452_v9  ;;  %2500 = vmatprep.mubr.msk.f32.mxu1 %vm3199_vm0, %v3200_v2 }
 0x398   :  { %2680 = vmatprep.subr.bf16.mxu1 %v3198_v1 }
 0x39b   :  { %2682 = vmatpush3.bf16.msra.mxu1 %v3456_v13 }
 0x39c   :  { %2689 = vmatprep.subr.bf16.mxu1 %v3198_v1 }
 0x469   :  { %v516_v40 = vpop.f32.mrb[2].mxu1 }
 0x46a   :  { %v520_v41 = vadd.f32 %v516_v40, %v293_v39  ;;  %v2480_v42 = vpop.f32.mrb[3].mxu1 }
 0x46c   :  { %v2285_v43 = vmul.f32 -1.442695, %v520_v41 }
 0x46e   :  { %2790 = vpow2.f32 %v2285_v43 }
 0x478   :  { %v2791_v44 = vpop.eup %2790 }
 0x479   :  { %v524_v45 = vadd.f32 1.0, %v2791_v44 }
 0x47b   :  { %2792 = vrcp.f32 %v524_v45 }
 0x485   :  { %v2793_v46 = vpop.eup %2792 }
 0x486   :  { %v527_v47 = vmul.f32 2.0, %v2793_v46  ;;  %v529_v51 = vmul.f32 %v2793_v46, %v434_v34 }
 0x488   :  { %v2286_v48 = vadd.f32 -1.0, %v527_v47 }
 0x48a   :  { %531 = vrot.lane.b32.xlu1 %v2286_v48, %s3201_s9 }
 0x4fc   :  { %v532_v49 = vpop.permute.xlu1 %531 }
 0x4fd   :  { %v534_v50 = vmul.f32 %v2793_v46, %v532_v49  ;;  %v308_v49 = vadd.f32 %v3474_v15, %v3505_v4 }
 0x4ff   :  { %536 = vrot.lane.b32.xlu0 %v534_v50, %s3202_s15 }
 0x571   :  { %v537_v52 = vpop.permute.xlu0 %536 }
 0x572   :  { %v539_v53 = vadd.f32 %v537_v52, %v529_v51 }
 0x574   :  { %2794 = vtanh.f32 %v539_v53 }
 0x57e   :  { %v2795_v60 = vpop.eup %2794 }
 0x57f   :  { %542 = vrot.lane.b32.xlu1 %v2795_v60, %s3201_s9 }
 0x5f1   :  { %v543_v61 = vpop.permute.xlu1 %542 }
 0x5f2   :  { %v545_v62 = vmul.f32 %v2793_v46, %v543_v61 }
 0x5f4   :  { %547 = vrot.lane.b32.xlu0 %v545_v62, %s3202_s15 }
 0x666   :  { %v548_v7 = vpop.permute.xlu0 %547 }
 0x667   :  { %551 = vst.msk [vmem:[#allocation2 + $0x8] sm:$0xff] %vm337_vm2, %v548_v7  ;;  %2490 = vmatmul.mubr.msk.f32.vlgmr.msra.gmra.mrb[8].mxu0 %vm337_vm2, %v548_v7 }
 0x668   :  { %2685 = vmatpush3.bf16.msra.mxu0 %v3452_v9  ;;  %2511 = vmatprep.mubr.msk.f32.mxu0 %vm3199_vm0, %v3200_v2 }
 0x669   :  { %2686 = vmatprep.subr.bf16.mxu0 %v3198_v1 }
 0x66c   :  { %2688 = vmatpush3.bf16.msra.mxu0 %v3456_v13 }
 0x66d   :  { %2695 = vmatprep.subr.bf16.mxu0 %v3198_v1 }
 0x73a   :  { %v622_v10 = vpop.f32.mrb[8].mxu0 }
 0x73b   :  { %v626_v11 = vadd.f32 %v622_v10, %v298_v8  ;;  %v2491_v12 = vpop.f32.mrb[9].mxu0  ;;  %v313_v10 = vadd.f32 %v3503_v3, %v3474_v15 }
 0x73d   :  { %v2288_v14 = vmul.f32 -1.442695, %v626_v11 }
 0x73f   :  { %2796 = vpow2.f32 %v2288_v14 }
 0x749   :  { %v2797_v16 = vpop.eup %2796 }
 0x74a   :  { %v630_v17 = vadd.f32 1.0, %v2797_v16 }
 0x74c   :  { %2798 = vrcp.f32 %v630_v17 }
 0x756   :  { %v2799_v18 = vpop.eup %2798 }
 0x757   :  { %v633_v19 = vmul.f32 2.0, %v2799_v18  ;;  %v635_v23 = vmul.f32 %v2799_v18, %v539_v53 }
 0x759   :  { %v2289_v20 = vadd.f32 -1.0, %v633_v19 }
 0x75b   :  { %637 = vrot.lane.b32.xlu1 %v2289_v20, %s3201_s9 }
 0x7cd   :  { %v638_v21 = vpop.permute.xlu1 %637 }
 0x7ce   :  { %v640_v22 = vmul.f32 %v2799_v18, %v638_v21 }
 0x7d0   :  { %642 = vrot.lane.b32.xlu0 %v640_v22, %s3202_s15 }
 0x842   :  { %v643_v24 = vpop.permute.xlu0 %642 }
 0x843   :  { %v645_v25 = vadd.f32 %v643_v24, %v635_v23  ;;  %v1194_v24 = vld [vmem:[#allocation16] sm:$0xff] }
 0x845   :  { %2800 = vtanh.f32 %v645_v25 }
 0x84f   :  { %v2801_v26 = vpop.eup %2800 }
 0x850   :  { %648 = vrot.lane.b32.xlu1 %v2801_v26, %s3201_s9 }
 0x8c2   :  { %v649_v27 = vpop.permute.xlu1 %648 }
 0x8c3   :  { %v651_v28 = vmul.f32 %v2799_v18, %v649_v27 }
 0x8c5   :  { %653 = vrot.lane.b32.xlu0 %v651_v28, %s3202_s15 }
 0x937   :  { %v654_v29 = vpop.permute.xlu0 %653 }
 0x938   :  { %657 = vst.msk [vmem:[#allocation2 + $0x10] sm:$0xff] %vm337_vm2, %v654_v29  ;;  %2501 = vmatmul.mubr.msk.f32.vlgmr.msra.gmra.mrb[4].mxu1 %vm337_vm2, %v654_v29 }
 0x939   :  { %2691 = vmatpush3.bf16.msra.mxu1 %v3452_v9  ;;  %2522 = vmatprep.mubr.msk.f32.mxu1 %vm3199_vm0, %v3200_v2 }
 0x93a   :  { %2692 = vmatprep.subr.bf16.mxu1 %v3198_v1 }
 0x93d   :  { %2694 = vmatpush3.bf16.msra.mxu1 %v3456_v13 }
 0x93e   :  { %2701 = vmatprep.subr.bf16.mxu1 %v3198_v1 }
 0xa0b   :  { %v728_v31 = vpop.f32.mrb[4].mxu1 }
 0xa0c   :  { %v732_v32 = vadd.f32 %v728_v31, %v303_v30  ;;  %v2502_v33 = vpop.f32.mrb[5].mxu1  ;;  %v1196_v30 = vld [vmem:[#allocation16 + $0x10] sm:$0xff]  ;;  %v1197_v31 = vld [vmem:[#allocation16 + $0x18] sm:$0xff] }
 0xa0e   :  { %v2291_v34 = vmul.f32 -1.442695, %v732_v32  ;;  %v2711_v32 = vpack.c.bf16 %v1197_v31, %v1196_v30 }
 0xa10   :  { %2802 = vpow2.f32 %v2291_v34  ;;  %v1203_v34 = vld [vmem:[#allocation2] sm:$0xff] }
 0xa1a   :  { %v2803_v35 = vpop.eup %2802 }
 0xa1b   :  { %v736_v36 = vadd.f32 1.0, %v2803_v35  ;;  %v1204_v35 = vld [vmem:[#allocation2 + $0x8] sm:$0xff] }
 0xa1d   :  { %2804 = vrcp.f32 %v736_v36  ;;  %v1205_v36 = vld [vmem:[#allocation2 + $0x10] sm:$0xff] }
 0xa27   :  { %v2805_v37 = vpop.eup %2804 }
 0xa28   :  { %v739_v38 = vmul.f32 2.0, %v2805_v37  ;;  %v741_v42 = vmul.f32 %v2805_v37, %v645_v25  ;;  %v1195_v25 = vld [vmem:[#allocation16 + $0x8] sm:$0xff] }
 0xa29   :  { %v2707_v26 = vpack.c.bf16 %v1195_v25, %v1194_v24 }
 0xa2a   :  { %v2292_v39 = vadd.f32 -1.0, %v739_v38 }
 0xa2c   :  { %743 = vrot.lane.b32.xlu1 %v2292_v39, %s3201_s9 }
 0xa9e   :  { %v744_v40 = vpop.permute.xlu1 %743 }
 0xa9f   :  { %v746_v41 = vmul.f32 %v2805_v37, %v744_v40  ;;  %v318_v40 = vadd.f32 %v3474_v15, %v3509_v6 }
 0xaa1   :  { %748 = vrot.lane.b32.xlu0 %v746_v41, %s3202_s15 }
 0xb13   :  { %v749_v43 = vpop.permute.xlu0 %748 }
 0xb14   :  { %v751_v44 = vadd.f32 %v749_v43, %v741_v42 }
 0xb16   :  { %2806 = vtanh.f32 %v751_v44 }
 0xb20   :  { %v2807_v45 = vpop.eup %2806 }
 0xb21   :  { %754 = vrot.lane.b32.xlu1 %v2807_v45, %s3201_s9 }
 0xb93   :  { %v755_v46 = vpop.permute.xlu1 %754 }
 0xb94   :  { %v757_v47 = vmul.f32 %v2805_v37, %v755_v46 }
 0xb96   :  { %759 = vrot.lane.b32.xlu0 %v757_v47, %s3202_s15 }
 0xc08   :  { %v760_v48 = vpop.permute.xlu0 %759 }
 0xc09   :  { %763 = vst.msk [vmem:[#allocation2 + $0x18] sm:$0xff] %vm337_vm2, %v760_v48  ;;  %2512 = vmatmul.mubr.msk.f32.vlgmr.msra.gmra.mrb[10].mxu0 %vm337_vm2, %v760_v48 }
 0xc0a   :  { %2697 = vmatpush3.bf16.msra.mxu0 %v3452_v9  ;;  %2533 = vmatprep.mubr.msk.f32.mxu0 %vm3199_vm0, %v3200_v2 }
 0xc0b   :  { %2698 = vmatprep.subr.bf16.mxu0 %v3198_v1 }
 0xc0e   :  { %2700 = vmatpush3.bf16.msra.mxu0 %v3456_v13 }
 0xc0f   :  { %2708 = vmatprep.subr.bf16.mxu0 %v2707_v26 }
 0xc10   :  { %v1206_v37 = vld [vmem:[#allocation2 + $0x18] sm:$0xff] }
 0xcdc   :  { %v834_v50 = vpop.f32.mrb[10].mxu0 }
 0xcdd   :  { %v838_v51 = vadd.f32 %v834_v50, %v308_v49  ;;  %v2513_v52 = vpop.f32.mrb[11].mxu0 }
 0xcdf   :  { %v2294_v53 = vmul.f32 -1.442695, %v838_v51 }
 0xce1   :  { %2808 = vpow2.f32 %v2294_v53 }
 0xceb   :  { %v2809_v54 = vpop.eup %2808 }
 0xcec   :  { %v842_v55 = vadd.f32 1.0, %v2809_v54 }
 0xcee   :  { %2810 = vrcp.f32 %v842_v55 }
 0xcf8   :  { %v2811_v56 = vpop.eup %2810 }
 0xcf9   :  { %v845_v57 = vmul.f32 2.0, %v2811_v56  ;;  %v847_v61 = vmul.f32 %v2811_v56, %v751_v44 }
 0xcfb   :  { %v2295_v58 = vadd.f32 -1.0, %v845_v57 }
 0xcfd   :  { %849 = vrot.lane.b32.xlu1 %v2295_v58, %s3201_s9 }
 0xd6f   :  { %v850_v59 = vpop.permute.xlu1 %849 }
 0xd70   :  { %v852_v60 = vmul.f32 %v2811_v56, %v850_v59 }
 0xd72   :  { %854 = vrot.lane.b32.xlu0 %v852_v60, %s3202_s15 }
 0xde4   :  { %v855_v62 = vpop.permute.xlu0 %854 }
 0xde5   :  { %v857_v63 = vadd.f32 %v855_v62, %v847_v61  ;;  %v1198_v61 = vld [vmem:[#allocation17] sm:$0xff]  ;;  %v1199_v62 = vld [vmem:[#allocation17 + $0x8] sm:$0xff] }
 0xde7   :  { %2812 = vtanh.f32 %v857_v63 }
 0xdf1   :  { %v2813_v0 = vpop.eup %2812 }
 0xdf2   :  { %860 = vrot.lane.b32.xlu1 %v2813_v0, %s3201_s9  ;;  %v1200_v0 = vld [vmem:[#allocation17 + $0x10] sm:$0xff] }
 0xe64   :  { %v861_v4 = vpop.permute.xlu1 %860 }
 0xe65   :  { %v863_v7 = vmul.f32 %v2811_v56, %v861_v4  ;;  %v1201_v4 = vld [vmem:[#allocation17 + $0x18] sm:$0xff] }
 0xe67   :  { %865 = vrot.lane.b32.xlu0 %v863_v7, %s3202_s15  ;;  %v3595_v7 = vpack.c.bf16 %v1201_v4, %v1200_v0 }
 0xed9   :  { %v866_v8 = vpop.permute.xlu0 %865 }
 0xeda   :  { %869 = vst.msk [vmem:[#allocation2 + $0x20] sm:$0xff] %vm337_vm2, %v866_v8  ;;  %2523 = vmatmul.mubr.msk.f32.vlgmr.msra.gmra.mrb[6].mxu1 %vm337_vm2, %v866_v8 }
 0xedb   :  { %2703 = vmatpush3.bf16.msra.mxu1 %v3452_v9  ;;  %2544 = vmatprep.mubr.msk.f32.mxu1 %vm3199_vm0, %v3200_v2 }
 0xedc   :  { %2704 = vmatprep.subr.bf16.mxu1 %v3198_v1 }
 0xedf   :  { %2706 = vmatpush3.bf16.msra.mxu1 %v3456_v13 }
 0xee0   :  { %2715 = vmatprep.subr.bf16.mxu1 %v3198_v1 }
 0xee1   :  { %v1207_v38 = vld [vmem:[#allocation2 + $0x20] sm:$0xff] }
 0xfad   :  { %v940_v11 = vpop.f32.mrb[6].mxu1 }
 0xfae   :  { %v944_v12 = vadd.f32 %v940_v11, %v313_v10  ;;  %v2524_v14 = vpop.f32.mrb[7].mxu1  ;;  %v1357_v11 = vld [vmem:[#allocation10 + $0x8] sm:$0xff] }
 0xfaf   :  { %v1355_v14 = vld [vmem:[#allocation8 + $0x8] sm:$0xff] }
 0xfb0   :  { %v2297_v16 = vmul.f32 -1.442695, %v944_v12 }
 0xfb2   :  { %2814 = vpow2.f32 %v2297_v16 }
 0xfbc   :  { %v2815_v17 = vpop.eup %2814 }
 0xfbd   :  { %v948_v18 = vadd.f32 1.0, %v2815_v17  ;;  %v323_v17 = vadd.f32 %v3507_v5, %v3474_v15 }
 0xfbf   :  { %2816 = vrcp.f32 %v948_v18 }
 0xfc9   :  { %v2817_v9 = vpop.eup %2816 }
 0xfca   :  { %v951_v19 = vmul.f32 2.0, %v2817_v9  ;;  %v953_v22 = vmul.f32 %v2817_v9, %v857_v63  ;;  %v3591_v63 = vpack.c.bf16 %v1199_v62, %v1198_v61 }
 0xfcc   :  { %v2298_v20 = vadd.f32 -1.0, %v951_v19 }
 0xfce   :  { %955 = vrot.lane.b32.xlu1 %v2298_v20, %s3201_s9  ;;  %v3619_v20 = vld [vmem:[#allocation19] ss:$0 sm:$0xff] }
0x1040   :  { %v956_v21 = vpop.permute.xlu1 %955 }
0x1041   :  { %v958_v13 = vmul.f32 %v2817_v9, %v956_v21 }
0x1043   :  { %960 = vrot.lane.b32.xlu0 %v958_v13, %s3202_s15 }
0x10b5   :  { %v961_v23 = vpop.permute.xlu0 %960 }
0x10b6   :  { %v963_v3 = vadd.f32 %v961_v23, %v953_v22 }
0x10b8   :  { %2818 = vtanh.f32 %v963_v3 }
0x10c2   :  { %v2819_v27 = vpop.eup %2818 }
0x10c3   :  { %966 = vrot.lane.b32.xlu1 %v2819_v27, %s3201_s9 }
0x1135   :  { %v967_v28 = vpop.permute.xlu1 %966 }
0x1136   :  { %v969_v29 = vmul.f32 %v2817_v9, %v967_v28 }
0x1138   :  { %971 = vrot.lane.b32.xlu0 %v969_v29, %s3202_s15 }
0x11aa   :  { %v972_v33 = vpop.permute.xlu0 %971 }
0x11ab   :  { %975 = vst.msk [vmem:[#allocation2 + $0x28] sm:$0xff] %vm337_vm2, %v972_v33  ;;  %2534 = vmatmul.mubr.msk.f32.vlgmr.msra.gmra.mrb[12].mxu0 %vm337_vm2, %v972_v33 }
0x11ac   :  { %2710 = vmatpush3.bf16.msra.mxu0 %v2707_v26  ;;  %2555 = vmatprep.mubr.msk.f32.mxu0 %vm337_vm2, %v1203_v34 }
0x11ad   :  { %2712 = vmatprep.subr.bf16.mxu0 %v2711_v32 }
0x11b0   :  { %2714 = vmatpush3.bf16.msra.mxu0 %v2711_v32 }
0x11b1   :  { %2727 = vmatprep.subr.bf16.mxu0 %v3198_v1 }
0x11b2   :  { %v1208_v39 = vld [vmem:[#allocation2 + $0x28] sm:$0xff] }
0x11b3   :  { %2556 = vmatmul.mubr.msk.f32.vlgmr.msra.gmra.mrb[14].mxu0 %vm337_vm2, %v1204_v35 }
0x11b4   :  { %2558 = vmatprep.mubr.msk.f32.mxu0 %vm337_vm2, %v1205_v36  ;;  %2729 = vmatpush3.bf16.msra.mxu0 %v3591_v63 }
0x11b5   :  { %2730 = vmatprep.subr.bf16.mxu0 %v3198_v1 }
0x11b7   :  { %2559 = vmatmul.mubr.msk.f32.gmra.mrb[16].mxu0 %vm337_vm2, %v1206_v37 }
0x11b8   :  { %2561 = vmatprep.mubr.msk.f32.mxu0 %vm337_vm2, %v1207_v38  ;;  %2732 = vmatpush3.bf16.msra.mxu0 %v3595_v7 }
0x11b9   :  { %2739 = vmatprep.subr.bf16.mxu0 %v3198_v1 }
0x11bb   :  { %2562 = vmatmul.mubr.msk.f32.gmra.mrb[18].mxu0 %vm337_vm2, %v1208_v39 }
0x127e   :  { %v1046_v41 = vpop.f32.mrb[12].mxu0 }
0x127f   :  { %v1050_v42 = vadd.f32 %v1046_v41, %v318_v40  ;;  %v2535_v43 = vpop.f32.mrb[13].mxu0 }
0x1281   :  { %v2300_v44 = vmul.f32 -1.442695, %v1050_v42 }
0x1283   :  { %2820 = vpow2.f32 %v2300_v44 }
0x1286   :  { %v3575_v45 = vpop.f32.mrb[14].mxu0 }
0x1287   :  { %v1307_v46 = vpop.f32.mrb[15].mxu0 }
0x1288   :  { %v1308_v21 = vadd.f32 %v3619_v20, %v1307_v46 }
0x128a   :  { %v3577_v47 = vpop.f32.mrb[16].mxu0 }
0x128b   :  { %v3579_v48 = vpop.f32.mrb[17].mxu0 }
0x128d   :  { %v2821_v49 = vpop.eup %2820 }
0x128e   :  { %v1054_v50 = vadd.f32 1.0, %v2821_v49  ;;  %v3581_v51 = vpop.f32.mrb[18].mxu0 }
0x128f   :  { %v3583_v52 = vpop.f32.mrb[19].mxu0 }
0x1290   :  { %2822 = vrcp.f32 %v1054_v50 }
0x129a   :  { %v2823_v6 = vpop.eup %2822 }
0x129b   :  { %v1057_v53 = vmul.f32 2.0, %v2823_v6  ;;  %v1059_v57 = vmul.f32 %v2823_v6, %v963_v3 }
0x129d   :  { %v2301_v54 = vadd.f32 -1.0, %v1057_v53 }
0x129f   :  { %1061 = vrot.lane.b32.xlu1 %v2301_v54, %s3201_s9 }
0x1311   :  { %v1062_v55 = vpop.permute.xlu1 %1061 }
0x1312   :  { %v1064_v56 = vmul.f32 %v2823_v6, %v1062_v55  ;;  %v1313_v55 = vadd.f32 %v3575_v45, %v3619_v20 }
0x1314   :  { %1066 = vrot.lane.b32.xlu0 %v1064_v56, %s3202_s15 }
0x1386   :  { %v1067_v58 = vpop.permute.xlu0 %1066 }
0x1387   :  { %v3587_v59 = vadd.f32 %v1067_v58, %v1059_v57 }
0x1389   :  { %2824 = vtanh.f32 %v3587_v59 }
0x1393   :  { %v2825_v60 = vpop.eup %2824 }
0x1394   :  { %1072 = vrot.lane.b32.xlu1 %v2825_v60, %s3201_s9 }
0x1406   :  { %v1073_v8 = vpop.permute.xlu1 %1072 }
0x1407   :  { %v1075_v10 = vmul.f32 %v2823_v6, %v1073_v8 }
0x1409   :  { %1077 = vrot.lane.b32.xlu0 %v1075_v10, %s3202_s15 }
0x140d   :  { %1442 = vrot.lane.b32.xlu0 %v1357_v11, %s3202_s15 }
0x147b   :  { %v1078_v12 = vpop.permute.xlu0 %1077 }
0x147c   :  { %1081 = vst.msk [vmem:[#allocation2 + $0x30] sm:$0xff] %vm337_vm2, %v1078_v12  ;;  %2545 = vmatmul.mubr.msk.f32.vlgmr.msra.gmra.mrb[8].mxu1 %vm337_vm2, %v1078_v12 }
0x147d   :  { %2717 = vmatpush3.bf16.msra.mxu1 %v3591_v63  ;;  %2575 = vmatprep.mubr.msk.f32.mxu1 %vm3199_vm0, %v3200_v2 }
0x147e   :  { %2718 = vmatprep.subr.bf16.mxu1 %v3198_v1 }
0x147f   :  { %v1443_v32 = vpop.permute.xlu0 %1442 }
0x1481   :  { %2720 = vmatpush3.bf16.msra.mxu1 %v3595_v7 }
0x1482   :  { %2721 = vmatprep.subr.bf16.mxu1 %v3198_v1 }
0x1483   :  { %v1209_v16 = vld [vmem:[#allocation2 + $0x30] sm:$0xff] }
0x1484   :  { %2576 = vmatmul.mubr.msk.f32.vlgmr.msra.gmra.mrb[10].mxu1 %vm337_vm2, %v1355_v14  ;;  %2564 = vmatprep.mubr.msk.f32.mxu0 %vm337_vm2, %v1209_v16 }
0x1485   :  { %2723 = vmatpush3.bf16.msra.mxu1 %v3591_v63  ;;  %2586 = vmatprep.mubr.msk.f32.mxu1 %vm3199_vm0, %v3200_v2 }
0x1486   :  { %2724 = vmatprep.subr.bf16.mxu1 %v3198_v1 }
0x1489   :  { %2726 = vmatpush3.bf16.msra.mxu1 %v3595_v7 }
0x148a   :  { %2733 = vmatprep.subr.bf16.mxu1 %v3198_v1 }
0x154f   :  { %v1152_v18 = vpop.f32.mrb[8].mxu1 }
0x1550   :  { %v1156_v9 = vadd.f32 %v1152_v18, %v323_v17  ;;  %v2546_v19 = vpop.f32.mrb[9].mxu1 }
0x1552   :  { %v2303_v29 = vmul.f32 -1.442695, %v1156_v9 }
0x1557   :  { %v1428_v13 = vpop.f32.mrb[10].mxu1 }
0x1558   :  { %v1432_v22 = vadd.f32 %v1428_v13, %v1308_v21  ;;  %v2577_v23 = vpop.f32.mrb[11].mxu1 }
0x155a   :  { %v2315_v3 = vmul.f32 -1.442695, %v1432_v22  ;;  %v1318_v22 = vadd.f32 %v3619_v20, %v3579_v48 }
0x155c   :  { %2826 = vpow2.f32 %v2315_v3 }
0x1566   :  { %v2827_v24 = vpop.eup %2826 }
0x1567   :  { %v1436_v25 = vadd.f32 1.0, %v2827_v24 }
0x1569   :  { %2828 = vrcp.f32 %v1436_v25 }
0x156a   :  { %2830 = vpow2.f32 %v2303_v29 }
0x1573   :  { %v2829_v26 = vpop.eup %2828 }
0x1574   :  { %v1439_v27 = vmul.f32 2.0, %v2829_v26  ;;  %v2831_v30 = vpop.eup %2830  ;;  %v1445_v33 = vmul.f32 %v2829_v26, %v1443_v32 }
0x1575   :  { %v1160_v31 = vadd.f32 1.0, %v2831_v30 }
0x1576   :  { %v2316_v28 = vadd.f32 -1.0, %v1439_v27 }
0x1577   :  { %2832 = vrcp.f32 %v1160_v31 }
0x1578   :  { %1447 = vrot.lane.b32.xlu1 %v2316_v28, %s3201_s9 }
0x1581   :  { %v2833_v36 = vpop.eup %2832 }
0x1582   :  { %v1163_v37 = vmul.f32 2.0, %v2833_v36  ;;  %v1165_v46 = vmul.f32 %v2833_v36, %v3587_v59 }
0x1584   :  { %v2304_v39 = vadd.f32 -1.0, %v1163_v37  ;;  %v1323_v37 = vadd.f32 %v3577_v47, %v3619_v20 }
0x15ea   :  { %v1448_v15 = vpop.permute.xlu1 %1447 }
0x15eb   :  { %v1450_v5 = vmul.f32 %v2829_v26, %v1448_v15 }
0x15ed   :  { %1452 = vrot.lane.b32.xlu1 %v1450_v5, %s3202_s15 }
0x165f   :  { %v1453_v34 = vpop.permute.xlu1 %1452 }
0x1660   :  { %v1455_v35 = vadd.f32 %v1453_v34, %v1445_v33 }
0x1662   :  { %2834 = vtanh.f32 %v1455_v35 }
0x166c   :  { %v2835_v38 = vpop.eup %2834 }
0x166d   :  { %1458 = vrot.lane.b32.xlu0 %v2835_v38, %s3201_s9 }
0x1671   :  { %1167 = vrot.lane.b32.xlu0 %v2304_v39, %s3201_s9 }
0x16df   :  { %v1459_v40 = vpop.permute.xlu0 %1458 }
0x16e0   :  { %v1461_v41 = vmul.f32 %v2829_v26, %v1459_v40 }
0x16e2   :  { %1464 = vrot.lane.b32.xlu1 %v1461_v41, %s3202_s15 }
0x16e3   :  { %v1168_v42 = vpop.permute.xlu0 %1167 }
0x16e4   :  { %v1170_v43 = vmul.f32 %v2833_v36, %v1168_v42 }
0x16e6   :  { %1172 = vrot.lane.b32.xlu0 %v1170_v43, %s3202_s15 }
0x1754   :  { %v1465_v44 = vpop.permute.xlu1 %1464 }
0x1755   :  { %2587 = vmatmul.mubr.msk.f32.vlgmr.msra.gmra.mrb[12].mxu1 %vm337_vm2, %v1465_v44 }
0x1756   :  { %2735 = vmatpush3.bf16.msra.mxu1 %v3591_v63  ;;  %2608 = vmatprep.mubr.msk.f32.mxu1 %vm3199_vm0, %v3200_v2 }
0x1757   :  { %2736 = vmatprep.subr.bf16.mxu1 %v3198_v1 }
0x1758   :  { %v1173_v49 = vpop.permute.xlu0 %1172 }
0x1759   :  { %v3634_v50 = vadd.f32 %v1173_v49, %v1165_v46 }
0x175a   :  { %2738 = vmatpush3.bf16.msra.mxu1 %v3595_v7 }
0x175b   :  { %2836 = vtanh.f32 %v3634_v50  ;;  %2745 = vmatprep.subr.bf16.mxu1 %v3198_v1 }
0x1765   :  { %v2837_v6 = vpop.eup %2836 }
0x1766   :  { %1178 = vrot.lane.b32.xlu0 %v2837_v6, %s3201_s9 }
0x17d8   :  { %v1179_v53 = vpop.permute.xlu0 %1178 }
0x17d9   :  { %v1181_v54 = vmul.f32 %v2833_v36, %v1179_v53 }
0x17db   :  { %1183 = vrot.lane.b32.xlu0 %v1181_v54, %s3202_s15 }
0x1828   :  { %v1534_v56 = vpop.f32.mrb[12].mxu1 }
0x1829   :  { %v1538_v57 = vadd.f32 %v1534_v56, %v1313_v55  ;;  %v2588_v58 = vpop.f32.mrb[13].mxu1 }
0x182b   :  { %v2318_v59 = vmul.f32 -1.442695, %v1538_v57 }
0x182d   :  { %2838 = vpow2.f32 %v2318_v59 }
0x1837   :  { %v2839_v60 = vpop.eup %2838 }
0x1838   :  { %v1542_v61 = vadd.f32 1.0, %v2839_v60  ;;  %v1328_v60 = vadd.f32 %v3619_v20, %v3583_v52 }
0x183a   :  { %2840 = vrcp.f32 %v1542_v61 }
0x1844   :  { %v2841_v62 = vpop.eup %2840 }
0x1845   :  { %v1545_v0 = vmul.f32 2.0, %v2841_v62  ;;  %v1547_v16 = vmul.f32 %v2841_v62, %v1455_v35 }
0x1847   :  { %v2319_v4 = vadd.f32 -1.0, %v1545_v0 }
0x1849   :  { %1549 = vrot.lane.b32.xlu1 %v2319_v4, %s3201_s9 }
0x184d   :  { %v1184_v8 = vpop.permute.xlu0 %1183 }
0x184e   :  { %1187 = vst.msk [vmem:[#allocation2 + $0x38] sm:$0xff] %vm337_vm2, %v1184_v8  ;;  %1188 = vst.msk [vmem:[#allocation22] sm:$0xff] %vm337_vm2, %v1184_v8 }
0x1855   :  { %v1210_v10 = vld [vmem:[#allocation2 + $0x38] sm:$0xff] }
0x1856   :  { %2565 = vmatmul.mubr.msk.f32.gmra.mrb[20].mxu0 %vm337_vm2, %v1210_v10 }
0x1857   :  { %2597 = vmatprep.mubr.msk.f32.mxu0 %vm3199_vm0, %v3200_v2 }
0x18bb   :  { %v1550_v45 = vpop.permute.xlu1 %1549 }
0x18bc   :  { %v1552_v11 = vmul.f32 %v2841_v62, %v1550_v45 }
0x18be   :  { %1554 = vrot.lane.b32.xlu1 %v1552_v11, %s3202_s15 }
0x1929   :  { %v3650_v12 = vpop.f32.mrb[20].mxu0 }
0x192a   :  { %v3652_v14 = vpop.f32.mrb[21].mxu0 }
0x1930   :  { %v1555_v17 = vpop.permute.xlu1 %1554 }
0x1931   :  { %v1557_v18 = vadd.f32 %v1555_v17, %v1547_v16 }
0x1933   :  { %2842 = vtanh.f32 %v1557_v18 }
0x193d   :  { %v2843_v9 = vpop.eup %2842 }
0x193e   :  { %1560 = vrot.lane.b32.xlu1 %v2843_v9, %s3201_s9 }
0x19b0   :  { %v1561_v19 = vpop.permute.xlu1 %1560 }
0x19b1   :  { %v1563_v21 = vmul.f32 %v2841_v62, %v1561_v19 }
0x19b3   :  { %1566 = vrot.lane.b32.xlu1 %v1563_v21, %s3202_s15 }
0x1a25   :  { %v1567_v13 = vpop.permute.xlu1 %1566 }
0x1a26   :  { %2598 = vmatmul.mubr.msk.f32.vlgmr.msra.gmra.mrb[22].mxu0 %vm337_vm2, %v1567_v13 }
0x1a27   :  { %2741 = vmatpush3.bf16.msra.mxu0 %v3591_v63  ;;  %2619 = vmatprep.mubr.msk.f32.mxu0 %vm3199_vm0, %v3200_v2 }
0x1a28   :  { %2742 = vmatprep.subr.bf16.mxu0 %v3198_v1 }
0x1a2b   :  { %2744 = vmatpush3.bf16.msra.mxu0 %v3595_v7 }
0x1a2c   :  { %2751 = vmatprep.subr.bf16.mxu0 %v3198_v1 }
0x1af9   :  { %v1636_v23 = vpop.f32.mrb[22].mxu0 }
0x1afa   :  { %v1640_v3 = vadd.f32 %v1636_v23, %v1318_v22  ;;  %v2599_v24 = vpop.f32.mrb[23].mxu0 }
0x1afc   :  { %v2321_v25 = vmul.f32 -1.442695, %v1640_v3  ;;  %v1333_v3 = vadd.f32 %v3581_v51, %v3619_v20 }
0x1afe   :  { %2844 = vpow2.f32 %v2321_v25 }
0x1b08   :  { %v2845_v26 = vpop.eup %2844 }
0x1b09   :  { %v1644_v27 = vadd.f32 1.0, %v2845_v26 }
0x1b0b   :  { %2846 = vrcp.f32 %v1644_v27 }
0x1b15   :  { %v2847_v28 = vpop.eup %2846 }
0x1b16   :  { %v1647_v15 = vmul.f32 2.0, %v2847_v28  ;;  %v1649_v31 = vmul.f32 %v2847_v28, %v1557_v18 }
0x1b18   :  { %v2322_v5 = vadd.f32 -1.0, %v1647_v15 }
0x1b1a   :  { %1651 = vrot.lane.b32.xlu0 %v2322_v5, %s3201_s9 }
0x1b8c   :  { %v1652_v29 = vpop.permute.xlu0 %1651 }
0x1b8d   :  { %v1654_v30 = vmul.f32 %v2847_v28, %v1652_v29 }
0x1b8f   :  { %1656 = vrot.lane.b32.xlu1 %v1654_v30, %s3202_s15 }
0x1c01   :  { %v1657_v32 = vpop.permute.xlu1 %1656 }
0x1c02   :  { %v1659_v48 = vadd.f32 %v1657_v32, %v1649_v31 }
0x1c04   :  { %2848 = vtanh.f32 %v1659_v48 }
0x1c0e   :  { %v2849_v33 = vpop.eup %2848 }
0x1c0f   :  { %1662 = vrot.lane.b32.xlu0 %v2849_v33, %s3201_s9 }
0x1c81   :  { %v1663_v34 = vpop.permute.xlu0 %1662 }
0x1c82   :  { %v1665_v35 = vmul.f32 %v2847_v28, %v1663_v34  ;;  %v1338_v34 = vadd.f32 %v3619_v20, %v3652_v14 }
0x1c84   :  { %1668 = vrot.lane.b32.xlu1 %v1665_v35, %s3202_s15 }
0x1cf6   :  { %v1669_v36 = vpop.permute.xlu1 %1668 }
0x1cf7   :  { %2609 = vmatmul.mubr.msk.f32.vlgmr.msra.gmra.mrb[14].mxu1 %vm337_vm2, %v1669_v36 }
0x1cf8   :  { %2747 = vmatpush3.bf16.msra.mxu1 %v3591_v63  ;;  %2630 = vmatprep.mubr.msk.f32.mxu1 %vm3199_vm0, %v3200_v2 }
0x1cf9   :  { %2748 = vmatprep.subr.bf16.mxu1 %v3198_v1 }
0x1cfc   :  { %2750 = vmatpush3.bf16.msra.mxu1 %v3595_v7 }
0x1cfd   :  { %2757 = vmatprep.subr.bf16.mxu1 %v3198_v1 }
0x1dca   :  { %v1738_v38 = vpop.f32.mrb[14].mxu1 }
0x1dcb   :  { %v1742_v39 = vadd.f32 %v1738_v38, %v1323_v37  ;;  %v2610_v40 = vpop.f32.mrb[15].mxu1 }
0x1dcd   :  { %v2324_v41 = vmul.f32 -1.442695, %v1742_v39 }
0x1dcf   :  { %2850 = vpow2.f32 %v2324_v41 }
0x1dd9   :  { %v2851_v42 = vpop.eup %2850 }
0x1dda   :  { %v1746_v43 = vadd.f32 1.0, %v2851_v42 }
0x1ddc   :  { %2852 = vrcp.f32 %v1746_v43 }
0x1de6   :  { %v2853_v44 = vpop.eup %2852 }
0x1de7   :  { %v1749_v46 = vmul.f32 2.0, %v2853_v44  ;;  %v1751_v54 = vmul.f32 %v2853_v44, %v1659_v48 }
0x1de9   :  { %v2325_v49 = vadd.f32 -1.0, %v1749_v46 }
0x1deb   :  { %1753 = vrot.lane.b32.xlu0 %v2325_v49, %s3201_s9 }
0x1e5d   :  { %v1754_v6 = vpop.permute.xlu0 %1753 }
0x1e5e   :  { %v1756_v53 = vmul.f32 %v2853_v44, %v1754_v6 }
0x1e60   :  { %1758 = vrot.lane.b32.xlu1 %v1756_v53, %s3202_s15 }
0x1ed2   :  { %v1759_v55 = vpop.permute.xlu1 %1758 }
0x1ed3   :  { %v1761_v47 = vadd.f32 %v1759_v55, %v1751_v54 }
0x1ed5   :  { %2854 = vtanh.f32 %v1761_v47 }
0x1edf   :  { %v2855_v56 = vpop.eup %2854 }
0x1ee0   :  { %1764 = vrot.lane.b32.xlu0 %v2855_v56, %s3201_s9  ;;  %v1343_v56 = vadd.f32 %v3650_v12, %v3619_v20 }
0x1f52   :  { %v1765_v57 = vpop.permute.xlu0 %1764 }
0x1f53   :  { %v1767_v58 = vmul.f32 %v2853_v44, %v1765_v57 }
0x1f55   :  { %1770 = vrot.lane.b32.xlu1 %v1767_v58, %s3202_s15 }
0x1fc7   :  { %v1771_v59 = vpop.permute.xlu1 %1770 }
0x1fc8   :  { %2620 = vmatmul.mubr.msk.f32.vlgmr.msra.gmra.mrb[24].mxu0 %vm337_vm2, %v1771_v59 }
0x1fc9   :  { %2753 = vmatpush3.bf16.msra.mxu0 %v3591_v63  ;;  %2641 = vmatprep.mubr.msk.f32.mxu0 %vm3199_vm0, %v3200_v2 }
0x1fca   :  { %2754 = vmatprep.subr.bf16.mxu0 %v3198_v1 }
0x1fcd   :  { %2756 = vmatpush3.bf16.msra.mxu0 %v3595_v7 }
0x209b   :  { %v1840_v61 = vpop.f32.mrb[24].mxu0 }
0x209c   :  { %v1844_v62 = vadd.f32 %v1840_v61, %v1328_v60  ;;  %v2621_v0 = vpop.f32.mrb[25].mxu0 }
0x209e   :  { %v2327_v4 = vmul.f32 -1.442695, %v1844_v62 }
0x20a0   :  { %2856 = vpow2.f32 %v2327_v4 }
0x20aa   :  { %v2857_v8 = vpop.eup %2856 }
0x20ab   :  { %v1848_v10 = vadd.f32 1.0, %v2857_v8 }
0x20ad   :  { %2858 = vrcp.f32 %v1848_v10 }
0x20b7   :  { %v2859_v45 = vpop.eup %2858 }
0x20b8   :  { %v1851_v11 = vmul.f32 2.0, %v2859_v45  ;;  %v1853_v9 = vmul.f32 %v2859_v45, %v1761_v47 }
0x20ba   :  { %v2328_v16 = vadd.f32 -1.0, %v1851_v11  ;;  %v2338_v11 = vld [vmem:[#allocation20] ss:$0 sm:$0xff] }
0x20bc   :  { %1855 = vrot.lane.b32.xlu0 %v2328_v16, %s3201_s9 }
0x212e   :  { %v1856_v17 = vpop.permute.xlu0 %1855 }
0x212f   :  { %v1858_v18 = vmul.f32 %v2859_v45, %v1856_v17 }
0x2131   :  { %1860 = vrot.lane.b32.xlu1 %v1858_v18, %s3202_s15 }
0x21a3   :  { %v1861_v19 = vpop.permute.xlu1 %1860 }
0x21a4   :  { %v1863_v52 = vadd.f32 %v1861_v19, %v1853_v9 }
0x21a6   :  { %2860 = vtanh.f32 %v1863_v52 }
0x21b0   :  { %v2861_v21 = vpop.eup %2860 }
0x21b1   :  { %1866 = vrot.lane.b32.xlu0 %v2861_v21, %s3201_s9 }
0x2223   :  { %v1867_v13 = vpop.permute.xlu0 %1866 }
0x2224   :  { %v1869_v22 = vmul.f32 %v2859_v45, %v1867_v13 }
0x2226   :  { %1872 = vrot.lane.b32.xlu1 %v1869_v22, %s3202_s15 }
0x2298   :  { %v1873_v23 = vpop.permute.xlu1 %1872 }
0x2299   :  { %2631 = vmatmul.mubr.msk.f32.vlgmr.msra.gmra.mrb[16].mxu1 %vm337_vm2, %v1873_v23 }
0x229a   :  { %2759 = vmatpush3.bf16.msra.mxu1 %v3591_v63  ;;  %2652 = vmatprep.mubr.msk.f32.mxu1 %vm3199_vm0, %v3200_v2 }
0x229b   :  { %2760 = vmatprep.subr.bf16.mxu1 %v3198_v1 }
0x229e   :  { %2762 = vmatpush3.bf16.msra.mxu1 %v3595_v7 }
0x236c   :  { %v1942_v24 = vpop.f32.mrb[16].mxu1 }
0x236d   :  { %v1946_v25 = vadd.f32 %v1942_v24, %v1333_v3  ;;  %v2632_v26 = vpop.f32.mrb[17].mxu1 }
0x236f   :  { %v2330_v27 = vmul.f32 -1.442695, %v1946_v25 }
0x2371   :  { %2862 = vpow2.f32 %v2330_v27 }
0x237b   :  { %v2863_v28 = vpop.eup %2862 }
0x237c   :  { %v1950_v15 = vadd.f32 1.0, %v2863_v28 }
0x237e   :  { %2864 = vrcp.f32 %v1950_v15 }
0x2388   :  { %v2865_v5 = vpop.eup %2864 }
0x2389   :  { %v1953_v63 = vmul.f32 2.0, %v2865_v5  ;;  %v1955_v7 = vmul.f32 %v2865_v5, %v1863_v52 }
0x238b   :  { %v2331_v29 = vadd.f32 -1.0, %v1953_v63 }
0x238d   :  { %1957 = vrot.lane.b32.xlu0 %v2331_v29, %s3201_s9 }
0x23ff   :  { %v1958_v2 = vpop.permute.xlu0 %1957 }
0x2400   :  { %v1960_v1 = vmul.f32 %v2865_v5, %v1958_v2 }
0x2402   :  { %1962 = vrot.lane.b32.xlu1 %v1960_v1, %s3202_s15 }
0x2474   :  { %v1963_v30 = vpop.permute.xlu1 %1962 }
0x2475   :  { %v1965_v51 = vadd.f32 %v1963_v30, %v1955_v7 }
0x2477   :  { %2866 = vtanh.f32 %v1965_v51 }
0x2481   :  { %v2867_v31 = vpop.eup %2866 }
0x2482   :  { %1968 = vrot.lane.b32.xlu0 %v2867_v31, %s3201_s9 }
0x24f4   :  { %v1969_v32 = vpop.permute.xlu0 %1968 }
0x24f5   :  { %v1971_v48 = vmul.f32 %v2865_v5, %v1969_v32 }
0x24f7   :  { %1974 = vrot.lane.b32.xlu1 %v1971_v48, %s3202_s15 }
0x2569   :  { %v1975_v33 = vpop.permute.xlu1 %1974 }
0x256a   :  { %2642 = vmatmul.mubr.msk.f32.vlgmr.msra.gmra.mrb[26].mxu0 %vm337_vm2, %v1975_v33 }
0x263d   :  { %v2044_v35 = vpop.f32.mrb[26].mxu0 }
0x263e   :  { %v2048_v36 = vadd.f32 %v2044_v35, %v1338_v34  ;;  %v2643_v37 = vpop.f32.mrb[27].mxu0 }
0x2640   :  { %v2333_v38 = vmul.f32 -1.442695, %v2048_v36 }
0x2642   :  { %2868 = vpow2.f32 %v2333_v38 }
0x264c   :  { %v2869_v39 = vpop.eup %2868 }
0x264d   :  { %v2052_v40 = vadd.f32 1.0, %v2869_v39 }
0x264f   :  { %2870 = vrcp.f32 %v2052_v40 }
0x2659   :  { %v2871_v41 = vpop.eup %2870 }
0x265a   :  { %v2055_v42 = vmul.f32 2.0, %v2871_v41  ;;  %v2057_v49 = vmul.f32 %v2871_v41, %v1965_v51 }
0x265c   :  { %v2334_v43 = vadd.f32 -1.0, %v2055_v42 }
0x265e   :  { %2059 = vrot.lane.b32.xlu0 %v2334_v43, %s3201_s9 }
0x26d0   :  { %v2060_v44 = vpop.permute.xlu0 %2059 }
0x26d1   :  { %v2062_v46 = vmul.f32 %v2871_v41, %v2060_v44 }
0x26d3   :  { %2064 = vrot.lane.b32.xlu1 %v2062_v46, %s3202_s15 }
0x2745   :  { %v2065_v6 = vpop.permute.xlu1 %2064 }
0x2746   :  { %v2067_v14 = vadd.f32 %v2065_v6, %v2057_v49 }
0x2748   :  { %2872 = vtanh.f32 %v2067_v14 }
0x2752   :  { %v2873_v53 = vpop.eup %2872 }
0x2753   :  { %2070 = vrot.lane.b32.xlu0 %v2873_v53, %s3201_s9 }
0x27c5   :  { %v2071_v54 = vpop.permute.xlu0 %2070 }
0x27c6   :  { %v2073_v55 = vmul.f32 %v2871_v41, %v2071_v54 }
0x27c8   :  { %2076 = vrot.lane.b32.xlu1 %v2073_v55, %s3202_s15 }
0x283a   :  { %v2077_v47 = vpop.permute.xlu1 %2076 }
0x283b   :  { %2653 = vmatmul.mubr.msk.f32.vlgmr.msra.gmra.mrb[18].mxu1 %vm337_vm2, %v2077_v47 }
0x290e   :  { %v2146_v57 = vpop.f32.mrb[18].mxu1 }
0x290f   :  { %v2150_v58 = vadd.f32 %v2146_v57, %v1343_v56  ;;  %v2654_v59 = vpop.f32.mrb[19].mxu1 }
0x2911   :  { %v2336_v60 = vmul.f32 -1.442695, %v2150_v58 }
0x2913   :  { %2874 = vpow2.f32 %v2336_v60 }
0x291d   :  { %v2875_v61 = vpop.eup %2874 }
0x291e   :  { %v2154_v62 = vadd.f32 1.0, %v2875_v61 }
0x2920   :  { %2876 = vrcp.f32 %v2154_v62 }
0x292a   :  { %v2877_v0 = vpop.eup %2876 }
0x292b   :  { %v2157_v4 = vmul.f32 2.0, %v2877_v0  ;;  %v2159_v20 = vmul.f32 %v2877_v0, %v2067_v14 }
0x292d   :  { %v2337_v8 = vadd.f32 -1.0, %v2157_v4 }
0x292f   :  { %2161 = vrot.lane.b32.xlu0 %v2337_v8, %s3201_s9 }
0x29a1   :  { %v2162_v10 = vpop.permute.xlu0 %2161 }
0x29a2   :  { %v2164_v45 = vmul.f32 %v2877_v0, %v2162_v10 }
0x29a4   :  { %2166 = vrot.lane.b32.xlu1 %v2164_v45, %s3202_s15 }
0x29a8   :  { %2194 = vrot.lane.b32.xlu1 %v2338_v11, %s3203_s16 }
0x2a16   :  { %v2167_v12 = vpop.permute.xlu1 %2166 }
0x2a17   :  { %v2169_v16 = vadd.f32 %v2167_v12, %v2159_v20 }
0x2a19   :  { %2878 = vtanh.f32 %v2169_v16 }
0x2a1a   :  { %v2195_v9 = vpop.permute.xlu1 %2194 }
0x2a23   :  { %v2879_v17 = vpop.eup %2878 }
0x2a24   :  { %2172 = vrot.lane.b32.xlu0 %v2879_v17, %s3201_s9 }
0x2a96   :  { %v2173_v18 = vpop.permute.xlu0 %2172 }
0x2a97   :  { %v2175_v19 = vmul.f32 %v2877_v0, %v2173_v18 }
0x2a99   :  { %v2197_v52 = vmul.f32 %v2195_v9, %v2175_v19 }
0x2a9b   :  { %2199 = vrot.lane.b32.xlu0 %v2197_v52, %s3202_s15 }
0x2a9f   :  { %1190 = vrot.lane.b32.xlu0 %v3634_v50, %s3203_s16 }
0x2aa3   :  { %2183 = vrot.lane.b32.xlu0 %v2169_v16, %s3203_s16 }
0x2aa7   :  { %2177 = vrot.lane.b32.xlu0 %v2175_v19, %s3202_s15 }
0x2b0d   :  { %v2200_v21 = vpop.permute.xlu0 %2199 }
0x2b0e   :  { %v2202_v13 = vsel %vm337_vm2, %v2200_v21, 0.0 }
0x2b0f   :  { %2203 = vadd.xlane.f32.xlu1 %v2202_v13 }
0x2b11   :  { %v1191_v22 = vpop.permute.xlu0 %1190 }
0x2b12   :  { %1193 = vst.msk [vmem:[#allocation23] sm:$0xff] %vm337_vm2, %v1191_v22 }
0x2b15   :  { %v2184_v23 = vpop.permute.xlu0 %2183 }
0x2b16   :  { %2187 = vst.msk [vmem:[#allocation23 + $0x8] sm:$0xff] %vm337_vm2, %v2184_v23 }
0x2b19   :  { %v2178_v3 = vpop.permute.xlu0 %2177 }
0x2b1a   :  { %2181 = vst.msk [vmem:[#allocation22 + $0x8] sm:$0xff] %vm337_vm2, %v2178_v3 }
0x2b1b   :  { %3115 = shalt.err (!%p3112_p0)
}
0x2b1c   :  { %s3116_s14 = scalar_lea.hbm %s3787_s12, 256 }
0x2b1d   :  { %p3117_p1 = scmp.ne.s32.totalorder %s3787_s12, %s3116_s14  ;;  %p3120_p2 = scmp.lt.u32.totalorder %s3116_s14, %s3787_s12 }
0x2b1f   :  { %p3122_p3 = pnand %p3120_p2, %p3117_p1 }
0x2b21   :  { %3125 = shalt.err (!%p3122_p3)
}
0x2b22   :  { %2244 = dma.vmem_to_hbm [thread:$0]  %s2239_s28, 256, %s3787_s12, [#allocation24], %s3188_s21, %s3188_s21, %s3189_s22  }
0x2b23   :  { %s3126_s18 = scalar_lea.vmem %s3726_s20, 256  ;;  %p3131_p5 = scmp.lt.s32.totalorder %s3726_s20, %s3726_s20 }
0x2b24   :  { %p3127_p4 = scmp.ne.s32.totalorder %s3726_s20, %s3126_s18  ;;  %p3132_p6 = scmp.lt.s32.totalorder %s3126_s18, %s3126_s18 }
0x2b26   :  { %p3133_p7 = por %p3132_p6, %p3131_p5 }
0x2b28   :  { %p3134_p8 = pnand %p3133_p7, %p3127_p4 }
0x2b2a   :  { %3137 = shalt.err (!%p3134_p8)
}
0x2b2b   :  { %s3138_s0 = scalar_lea.hbm %s3786_s11, 256 }
0x2b2c   :  { %p3139_p9 = scmp.ne.s32.totalorder %s3786_s11, %s3138_s0  ;;  %p3142_p10 = scmp.lt.u32.totalorder %s3138_s0, %s3786_s11 }
0x2b2e   :  { %p3144_p11 = pnand %p3142_p10, %p3139_p9 }
0x2b30   :  { %3147 = shalt.err (!%p3144_p11)
}
0x2b31   :  { %2232 = dma.vmem_to_hbm [thread:$0]  %s3726_s20, 256, %s3786_s11, [#allocation7], %s3188_s21, %s3188_s21, %s3189_s22   ;;  %v2339_v50 = vld [vmem:[#allocation4] ss:$0 sm:$0xff]  ;;  %vm2219_vm3 = vcmask 7168  }
0x2b32   :  { %s3206_s9 = smov [#allocation25]  }
0x2b33   :  { %s2251_s15 = sshll.u32 %s3206_s9, 4  ;;  %s2252_s15 = int_to_ptr.vmem [resolvable:$true] %s2251_s15 }
0x2b34   :  { %s3148_s16 = scalar_lea.vmem %s2252_s15, 128  ;;  %p3153_p13 = scmp.lt.s32.totalorder %s2252_s15, %s2252_s15 }
0x2b35   :  { %p3149_p12 = scmp.ne.s32.totalorder %s2252_s15, %s3148_s16  ;;  %p3154_p0 = scmp.lt.s32.totalorder %s3148_s16, %s3148_s16 }
0x2b37   :  { %p3155_p1 = por %p3154_p0, %p3153_p13 }
0x2b39   :  { %p3156_p2 = pnand %p3155_p1, %p3149_p12 }
0x2b9c   :  { %v2204_v24 = vpop.xlane.xlu1 %2203 }
0x2b9d   :  { %v2212_v25 = vadd.f32 %v2339_v50, %v2204_v24 }
0x2b9f   :  { %v2340_v26 = vmul.f32 -1.442695, %v2212_v25 }
0x2ba1   :  { %2880 = vpow2.f32 %v2340_v26 }
0x2bab   :  { %v2881_v27 = vpop.eup %2880 }
0x2bac   :  { %v2216_v28 = vadd.f32 1.0, %v2881_v27 }
0x2bae   :  { %2882 = vrcp.f32 %v2216_v28 }
0x2bb8   :  { %v2883_v15 = vpop.eup %2882 }
0x2bb9   :  { %2220 = vst.msk [vmem:[#allocation25] sm:$0xff] %vm2219_vm3, %v2883_v15 }
0x2bba   :  { %3159 = shalt.err (!%p3156_p2)
}
0x2bbb   :  { %s3160_s22 = scalar_lea.hbm %s3788_s13, 128 }
0x2bbc   :  { %p3161_p3 = scmp.ne.s32.totalorder %s3788_s13, %s3160_s22  ;;  %p3164_p4 = scmp.lt.u32.totalorder %s3160_s22, %s3788_s13 }
0x2bbe   :  { %p3166_p5 = pnand %p3164_p4, %p3161_p3 }
0x2bc0   :  { %3169 = shalt.err (!%p3166_p5)
}
0x2bc1   :  { %2254 = dma.vmem_to_hbm [thread:$0]  %s2252_s15, 128, %s3788_s13, [#allocation24]  }
0x2bc2   :  { %3182 = dma.done.wait [#allocation7], 256  }
0x2bc3   :  { %3183 = vsyncadd [#allocation7], 4294967040 }
0x2bc4   :  { %3184 = dma.done.wait [#allocation24], 384  }
0x2bc5   :  { %3185 = vsyncadd [#allocation24], 4294966912 }
0x2bc6   :  { %2264 = vsyncpa [#allocation6], 1 }
0x2bc7   :  { %2265 = vsyncpa [#allocation9], 1 }
0x2bc8   :  { %2266 = vsyncpa [#allocation12], 1 }
0x2bc9   :  { %2267 = vsyncpa [#allocation15], 1 }
0x2bca   :  { %2268 = vsyncpa [#allocation18], 1 }
0x2bcb   :  { %2269 = vsyncpa [#allocation21], 1 }
0x2bcc   :  { %2270 = vsyncpa [#allocation7], 1 }
0x2bcd   :  { %2271 = vsyncpa [#allocation24], 1 }

</bundles_post_ra>
